<compile_context>
chip_gen: v7x
topology: tpu7x:2x2x1
jax: 0.10.0
libtpu: 0.0.40
codegen_flags: <defaults>
</compile_context>

<pallas_src>
import math
from functools import partial

import jax
import jax.numpy as jnp
from jax import lax
from jax.experimental import pallas as pl
from jax.experimental.pallas import tpu as pltpu

HIDDEN = 32          # hidden_size
NUM_HEADS = 4        # num_heads
INNER = 64           # inner_linear
LN_EPS = 1e-5
LANE = 128
NEG_INF = -1e30      # finite mask value (NaN-safe)


# ---------------------------------------------------------------------------
# shared math helpers
# ---------------------------------------------------------------------------
def _layer_norm(x, gamma, beta, eps=LN_EPS):
    mean = jnp.mean(x, axis=-1, keepdims=True)
    xc = x - mean
    var = jnp.mean(xc * xc, axis=-1, keepdims=True)
    return xc * lax.rsqrt(var + eps) * gamma + beta


# ---------------------------------------------------------------------------
# parameter slab layout: one operand, every in-kernel slice (8,128)-aligned
# ---------------------------------------------------------------------------
def _slab_layout(hidden, inner):
    """Returns ({name: (row0, row1, col0, col1)}, slab_shape).

    Each matrix owns a full 128-lane column tile (slice starts at a multiple of
    128 lanes, row 0); bias / LayerNorm vectors live in sublane-aligned spare
    rows underneath the matrices, one vector per column tile.
    """
    H, I = hidden, inner
    assert 3 * H <= LANE and I <= LANE, "parameter wider than one 128-lane tile"
    lay = {}
    mats = [("m_wqkv", H, 3 * H), ("m_wo", H, H),
            ("c_wq", H, H), ("c_wkv", H, 2 * H), ("c_wo", H, H),
            ("fc_w1", H, I), ("fc_w2", I, H)]
    for t, (name, rows, cols) in enumerate(mats):
        lay[name] = (0, rows, t * LANE, t * LANE + cols)
    n_tiles = len(mats)

    max_rows = max(rows for _, rows, _ in mats)
    vrow0 = ((max_rows + 7) // 8) * 8            # first sublane-aligned spare row
    vec_rows = [
        [("m_bqkv", 3 * H), ("m_bo", H), ("c_bq", H), ("c_bkv", 2 * H),
         ("c_bo", H), ("fc_b1", I), ("fc_b2", H)],
        [("ln1_g", H), ("ln1_b", H), ("ln2_g", H), ("ln2_b", H),
         ("ln3_g", H), ("ln3_b", H)],
    ]
    for i, row in enumerate(vec_rows):
        assert len(row) <= n_tiles
        r = vrow0 + 8 * i
        for t, (name, cols) in enumerate(row):
            lay[name] = (r, r + 1, t * LANE, t * LANE + cols)
    total_rows = ((vrow0 + 8 * (len(vec_rows) - 1) + 1 + 7) // 8) * 8
    return lay, (total_rows, n_tiles * LANE)


def _pack_params(params, hidden=HIDDEN, inner=INNER):
    """Pack all 26 DecoderBlock parameters into one aligned f32 slab.

    (In a real model this runs once at weight-load time, not per forward call.)
    """
    lay, shape = _slab_layout(hidden, inner)
    fused = {
        "m_wqkv": jnp.concatenate([params["m_wq"], params["m_wk"], params["m_wv"]], axis=1),
        "m_bqkv": jnp.concatenate([params["m_bq"], params["m_bk"], params["m_bv"]], axis=1),
        "c_wkv": jnp.concatenate([params["c_wk"], params["c_wv"]], axis=1),
        "c_bkv": jnp.concatenate([params["c_bk"], params["c_bv"]], axis=1),
    }
    for name in ("m_wo", "m_bo", "c_wq", "c_bq", "c_wo", "c_bo",
                 "fc_w1", "fc_b1", "fc_w2", "fc_b2",
                 "ln1_g", "ln1_b", "ln2_g", "ln2_b", "ln3_g", "ln3_b"):
        fused[name] = params[name]
    slab = jnp.zeros(shape, jnp.float32)
    for name, (r0, r1, c0, c1) in lay.items():
        slab = slab.at[r0:r1, c0:c1].set(fused[name].astype(jnp.float32))
    return slab, lay


# ---------------------------------------------------------------------------
# Pallas kernel: one invocation, whole problem in VMEM
# ---------------------------------------------------------------------------
def _decoder_block_kernel(x_ref, ctx_ref, w_ref, out_ref, *,
                          lay, num_heads, kv_len):
    B, T, H = x_ref.shape
    Spad = ctx_ref.shape[1]
    NH = num_heads
    d = H // NH
    scale = 1.0 / math.sqrt(d)

    def param(name):                      # every slice is (8,128)-aligned by layout
        r0, r1, c0, c1 = lay[name]
        return w_ref[r0:r1, c0:c1]

    x2 = x_ref[...].reshape(B * T, H)         # fold batch into the matmul M dim (T=8)
    ctx2 = ctx_ref[...].reshape(B * Spad, H)  # Spad sublane-aligned -> free reshape

    # additive softmax masks, built ONCE at full shape (no per-head broadcasts/selects)
    t_row = lax.broadcasted_iota(jnp.int32, (B, T, T), 1)
    t_col = lax.broadcasted_iota(jnp.int32, (B, T, T), 2)
    causal_bias = jnp.where(t_col > t_row, NEG_INF, 0.0).astype(jnp.float32)
    if Spad > kv_len:
        s_col = lax.broadcasted_iota(jnp.int32, (B, T, Spad), 2)
        kpad_bias = jnp.where(s_col >= kv_len, NEG_INF, 0.0).astype(jnp.float32)
    else:
        kpad_bias = None

    def attention(q2, k2, v2, kv_pad, w_o, b_o, mask_bias, exact_softmax):
        """q2:(B*T,H)  k2,v2:(B*kv_pad,H)  mask_bias:(B,T,kv_pad) or None.
        Returns (out:(B*T,H), per-head softmax weights, each (B*T, kv_pad))."""
        acc = jnp.zeros((B * T, H), jnp.float32)
        attn_heads = []
        for h in range(NH):
            qh = q2[:, h * d:(h + 1) * d].reshape(B, T, d)
            kh = k2[:, h * d:(h + 1) * d].reshape(B, kv_pad, d)
            vh = v2[:, h * d:(h + 1) * d].reshape(B, kv_pad, d)
            s = jnp.einsum('btd,bsd->bts', qh, kh,
                           preferred_element_type=jnp.float32)
            if mask_bias is not None:
                s = s + mask_bias                      # single vadd; mask hoisted
            s = s - jnp.max(s, axis=-1, keepdims=True)
            e = jnp.exp(s)
            denom = jnp.sum(e, axis=-1, keepdims=True)
            if exact_softmax:
                p = e / denom                              # exported weights: exact
            else:
                p = e * pl.reciprocal(denom, approx=True)  # EUP slot, frees the VPU
            o = jnp.einsum('bts,bsd->btd', p, vh,
                           preferred_element_type=jnp.float32)
            # per-head output projection: sublane-aligned W_o row slice, no concat
            acc = acc + jnp.dot(o.reshape(B * T, d), w_o[h * d:(h + 1) * d, :],
                                preferred_element_type=jnp.float32)
            attn_heads.append(p.reshape(B * T, kv_pad))
        return acc + b_o, attn_heads

    # --- masked (causal) self-attention + residual + lnorm1 -----------------
    res = x2
    qkv = jnp.dot(x2, param("m_wqkv"),
                  preferred_element_type=jnp.float32) + param("m_bqkv")
    y2, _ = attention(qkv[:, :H] * scale, qkv[:, H:2 * H], qkv[:, 2 * H:3 * H],
                      T, param("m_wo"), param("m_bo"), causal_bias,
                      exact_softmax=False)
    x2 = _layer_norm(y2 + res, param("ln1_g"), param("ln1_b"))

    # --- encoder-decoder cross-attention + residual + lnorm2 ----------------
    res = x2
    q2 = (jnp.dot(x2, param("c_wq"),
                  preferred_element_type=jnp.float32) + param("c_bq")) * scale
    kv = jnp.dot(ctx2, param("c_wkv"),
                 preferred_element_type=jnp.float32) + param("c_bkv")
    y2, attn_heads = attention(q2, kv[:, :H], kv[:, H:2 * H],
                               Spad, param("c_wo"), param("c_bo"), kpad_bias,
                               exact_softmax=True)
    x2 = _layer_norm(y2 + res, param("ln2_g"), param("ln2_b"))

    # --- position-wise feed-forward + residual + lnorm3 ---------------------
    res = x2
    h1 = jnp.maximum(
        jnp.dot(x2, param("fc_w1"),
                preferred_element_type=jnp.float32) + param("fc_b1"), 0.0)
    y2 = jnp.dot(h1, param("fc_w2"),
                 preferred_element_type=jnp.float32) + param("fc_b2")
    x2 = _layer_norm(y2 + res, param("ln3_g"), param("ln3_b"))

    # --- single lane-dense output store: [ x | attn heads | zero pad ] ------
    pad = out_ref.shape[-1] - (H + NH * Spad)
    pieces = [x2] + attn_heads
    if pad:
        pieces.append(jnp.zeros((B * T, pad), jnp.float32))
    out_ref[...] = jnp.concatenate(pieces, axis=-1).astype(out_ref.dtype)


# ---------------------------------------------------------------------------
# wrapper
# ---------------------------------------------------------------------------
def decoder_block(inputs, context, params, *, num_heads=NUM_HEADS):
    B, T, H = inputs.shape
    S = context.shape[1]
    Spad = ((S + 7) // 8) * 8                        # sublane-align the KV length
    slab, lay = _pack_params(params, hidden=H, inner=params["fc_w1"].shape[1])
    ctx = context if Spad == S else jnp.pad(context, ((0, 0), (0, Spad - S), (0, 0)))
    out_w = ((H + num_heads * Spad + LANE - 1) // LANE) * LANE   # lane-dense output

    vmem = pl.BlockSpec(memory_space=pltpu.MemorySpace.VMEM)
    packed = pl.pallas_call(
        partial(_decoder_block_kernel, lay=lay, num_heads=num_heads, kv_len=S),
        out_shape=jax.ShapeDtypeStruct((B * T, out_w), jnp.float32),
        in_specs=[vmem, vmem, vmem],
        out_specs=vmem,
    )(inputs, ctx, slab)

    out = packed[:, :H].reshape(B, T, H).astype(inputs.dtype)
    attn = packed[:, H:H + num_heads * Spad].reshape(B, T, num_heads, Spad)
    attn = attn.transpose(0, 2, 1, 3)[:, :, :, :S]   # PyTorch (B, NH, T, S) layout
    return out, attn


# ---------------------------------------------------------------------------
# independent pure-JAX reference (per-head / per-batch formulation)
# ---------------------------------------------------------------------------
def _reference_mha(x, kv, wq, bq, wk, bk, wv, bv, wo, bo, *, num_heads, causal):
    T, H = x.shape
    S = kv.shape[0]
    d = H // num_heads
    scale = 1.0 / math.sqrt(d)
    q = jnp.dot(x, wq) + bq
    k = jnp.dot(kv, wk) + bk
    v = jnp.dot(kv, wv) + bv
    outs, attns = [], []
    for h in range(num_heads):
        qh = q[:, h * d:(h + 1) * d]
        kh = k[:, h * d:(h + 1) * d]
        vh = v[:, h * d:(h + 1) * d]
        s = jnp.dot(qh, kh.T) * scale
        if causal:
            row = lax.broadcasted_iota(jnp.int32, (T, S), 0)
            col = lax.broadcasted_iota(jnp.int32, (T, S), 1)
            s = jnp.where(col > row, -jnp.inf, s)
        s = s - jnp.max(s, axis=-1, keepdims=True)
        e = jnp.exp(s)
        p = e / jnp.sum(e, axis=-1, keepdims=True)
        outs.append(jnp.dot(p, vh))
        attns.append(p)
    out = jnp.dot(jnp.concatenate(outs, axis=-1), wo) + bo
    return out, attns


def decoder_block_reference(inputs, context, params, *, num_heads=NUM_HEADS):
    def one(x, ctx):
        res = x
        y, _ = _reference_mha(
            x, x, params["m_wq"], params["m_bq"], params["m_wk"], params["m_bk"],
            params["m_wv"], params["m_bv"], params["m_wo"], params["m_bo"],
            num_heads=num_heads, causal=True)
        x = _layer_norm(y + res, params["ln1_g"], params["ln1_b"])
        res = x
        y, attns = _reference_mha(
            x, ctx, params["c_wq"], params["c_bq"], params["c_wk"], params["c_bk"],
            params["c_wv"], params["c_bv"], params["c_wo"], params["c_bo"],
            num_heads=num_heads, causal=False)
        x = _layer_norm(y + res, params["ln2_g"], params["ln2_b"])
        res = x
        h = jnp.maximum(jnp.dot(x, params["fc_w1"]) + params["fc_b1"], 0.0)
        y = jnp.dot(h, params["fc_w2"]) + params["fc_b2"]
        x = _layer_norm(y + res, params["ln3_g"], params["ln3_b"])
        return x, jnp.stack(attns, axis=0)
    return jax.vmap(one)(inputs, context)


# ---------------------------------------------------------------------------
# deterministic parameter init (synthetic; module __init__ defines the shapes)
# ---------------------------------------------------------------------------
def init_params(key, hidden=HIDDEN, inner=INNER):
    params = {}
    keys = iter(jax.random.split(key, 64))

    def mat(fan_in, fan_out):
        return 0.1 * jax.random.normal(next(keys), (fan_in, fan_out), jnp.float32)

    def vec(dim, scale=0.01):
        return scale * jax.random.normal(next(keys), (1, dim), jnp.float32)

    for prefix in ("m", "c"):  # masked self-attn, cross-attn
        for name in ("q", "k", "v", "o"):
            params[f"{prefix}_w{name}"] = mat(hidden, hidden)
            params[f"{prefix}_b{name}"] = vec(hidden)
    for i in (1, 2, 3):
        params[f"ln{i}_g"] = 1.0 + vec(hidden, scale=0.05)
        params[f"ln{i}_b"] = vec(hidden)
    params["fc_w1"] = mat(hidden, inner)
    params["fc_b1"] = vec(inner)
    params["fc_w2"] = mat(inner, hidden)
    params["fc_b2"] = vec(hidden)
    return params


if __name__ == "__main__":
    B, T, S = 2, 8, 12
    key = jax.random.PRNGKey(0)
    k_in, k_ctx, k_par = jax.random.split(key, 3)

    inputs = jax.random.normal(k_in, (B, T, HIDDEN), jnp.float32)
    context = jax.random.normal(k_ctx, (B, S, HIDDEN), jnp.float32)
    params = init_params(k_par)

    out, attn_enc = decoder_block(inputs, context, params)
    out = jax.block_until_ready(out)
    attn_enc = jax.block_until_ready(attn_enc)

    ref_out, ref_attn = decoder_block_reference(inputs, context, params)
    assert out.shape == (B, T, HIDDEN) and attn_enc.shape == (B, NUM_HEADS, T, S)
    # tolerance accounts for the approximate EUP reciprocal inside the (internal)
    # masked self-attention softmax; the exported cross-attention softmax is exact.
    assert jnp.allclose(out, ref_out, atol=2e-3, rtol=2e-3)
    assert jnp.allclose(attn_enc, ref_attn, atol=2e-3, rtol=2e-3)

    # TODO(synk): set_mask / external padding masks are not exercised by forward()
    # (only the built-in causal mask of masked_attention is applied); dropout=0 is identity.
    print("KERNEL_OK")
</pallas_src>

<mosaic_0001>
module attributes {stable_mosaic.version = 11 : i64} {
  func.func @_decoder_block_kernel(%arg0: memref<2x8x32xf32, #tpu.memory_space<vmem>>, %arg1: memref<2x16x32xf32, #tpu.memory_space<vmem>>, %arg2: memref<80x896xf32, #tpu.memory_space<vmem>>, %arg3: memref<16x128xf32, #tpu.memory_space<vmem>>) attributes {dimension_semantics = [], scalar_prefetch = 0 : i64, scratch_operands = 0 : i64, tpu.core_type = #tpu.core_type<tc>} {
    %c0 = arith.constant 0 : index
    %c0_0 = arith.constant 0 : index
    %c0_1 = arith.constant 0 : index
    %0 = vector.load %arg0[%c0, %c0_0, %c0_1] : memref<2x8x32xf32, #tpu.memory_space<vmem>>, vector<2x8x32xf32>
    %1 = vector.shape_cast %0 : vector<2x8x32xf32> to vector<16x32xf32>
    %c0_2 = arith.constant 0 : index
    %c0_3 = arith.constant 0 : index
    %c0_4 = arith.constant 0 : index
    %2 = vector.load %arg1[%c0_2, %c0_3, %c0_4] : memref<2x16x32xf32, #tpu.memory_space<vmem>>, vector<2x16x32xf32>
    %3 = vector.shape_cast %2 : vector<2x16x32xf32> to vector<32x32xf32>
    %4 = tpu.iota {dimensions = array<i32: 1>} : vector<2x8x8xi32>
    %5 = tpu.iota {dimensions = array<i32: 2>} : vector<2x8x8xi32>
    %6 = arith.cmpi sgt, %5, %4 : vector<2x8x8xi32>
    %cst = arith.constant -1.000000e+30 : f32
    %cst_5 = arith.constant 0.000000e+00 : f32
    %7 = vector.broadcast %cst : f32 to vector<2x8x8xf32>
    %8 = vector.broadcast %cst_5 : f32 to vector<2x8x8xf32>
    %9 = arith.select %6, %7, %8 : vector<2x8x8xi1>, vector<2x8x8xf32>
    %10 = tpu.iota {dimensions = array<i32: 2>} : vector<2x8x16xi32>
    %c12_i32 = arith.constant 12 : i32
    %11 = vector.broadcast %c12_i32 : i32 to vector<2x8x16xi32>
    %12 = arith.cmpi sge, %10, %11 : vector<2x8x16xi32>
    %cst_6 = arith.constant -1.000000e+30 : f32
    %cst_7 = arith.constant 0.000000e+00 : f32
    %13 = vector.broadcast %cst_6 : f32 to vector<2x8x16xf32>
    %14 = vector.broadcast %cst_7 : f32 to vector<2x8x16xf32>
    %15 = arith.select %12, %13, %14 : vector<2x8x16xi1>, vector<2x8x16xf32>
    %c0_8 = arith.constant 0 : index
    %c0_9 = arith.constant 0 : index
    %16 = vector.load %arg2[%c0_8, %c0_9] : memref<80x896xf32, #tpu.memory_space<vmem>>, vector<32x96xf32>
    %cst_10 = arith.constant dense<0.000000e+00> : vector<16x96xf32>
    %17 = tpu.matmul %1, %16, %cst_10 {dimension_numbers = #tpu.dot_dimension_numbers<[1], [0], [0], [1], [0, 0, 1, 1], [], []>} : vector<16x32xf32>, vector<32x96xf32>, vector<16x96xf32> -> vector<16x96xf32>
    %c64 = arith.constant 64 : index
    %c0_11 = arith.constant 0 : index
    %18 = vector.load %arg2[%c64, %c0_11] : memref<80x896xf32, #tpu.memory_space<vmem>>, vector<1x96xf32>
    %19 = vector.broadcast %18 : vector<1x96xf32> to vector<16x96xf32>
    %20 = arith.addf %17, %19 : vector<16x96xf32>
    %21 = vector.extract_strided_slice %20 {offsets = [0, 0], sizes = [16, 32], strides = [1, 1]} : vector<16x96xf32> to vector<16x32xf32>
    %cst_12 = arith.constant 0.353553385 : f32
    %22 = vector.broadcast %cst_12 : f32 to vector<16x32xf32>
    %23 = arith.mulf %21, %22 : vector<16x32xf32>
    %24 = vector.extract_strided_slice %20 {offsets = [0, 32], sizes = [16, 32], strides = [1, 1]} : vector<16x96xf32> to vector<16x32xf32>
    %25 = vector.extract_strided_slice %20 {offsets = [0, 64], sizes = [16, 32], strides = [1, 1]} : vector<16x96xf32> to vector<16x32xf32>
    %c0_13 = arith.constant 0 : index
    %c128 = arith.constant 128 : index
    %26 = vector.load %arg2[%c0_13, %c128] : memref<80x896xf32, #tpu.memory_space<vmem>>, vector<32x32xf32>
    %c64_14 = arith.constant 64 : index
    %c128_15 = arith.constant 128 : index
    %27 = vector.load %arg2[%c64_14, %c128_15] : memref<80x896xf32, #tpu.memory_space<vmem>>, vector<1x32xf32>
    %cst_16 = arith.constant 0.000000e+00 : f32
    %28 = vector.broadcast %cst_16 : f32 to vector<16x32xf32>
    %29 = vector.extract_strided_slice %23 {offsets = [0, 0], sizes = [16, 8], strides = [1, 1]} : vector<16x32xf32> to vector<16x8xf32>
    %30 = vector.shape_cast %29 : vector<16x8xf32> to vector<2x8x8xf32>
    %31 = vector.extract_strided_slice %24 {offsets = [0, 0], sizes = [16, 8], strides = [1, 1]} : vector<16x32xf32> to vector<16x8xf32>
    %32 = vector.shape_cast %31 : vector<16x8xf32> to vector<2x8x8xf32>
    %33 = vector.extract_strided_slice %25 {offsets = [0, 0], sizes = [16, 8], strides = [1, 1]} : vector<16x32xf32> to vector<16x8xf32>
    %34 = vector.shape_cast %33 : vector<16x8xf32> to vector<2x8x8xf32>
    "tpu.trace_start"() <{level = 10 : i32, message = "btd,bsd->bts"}> : () -> ()
    %cst_17 = arith.constant dense<0.000000e+00> : vector<2x8x8xf32>
    %35 = tpu.matmul %30, %32, %cst_17 {dimension_numbers = #tpu.dot_dimension_numbers<[2], [2], [1], [1], [0, 0, 0, 1, 1, 1], [0], [0]>} : vector<2x8x8xf32>, vector<2x8x8xf32>, vector<2x8x8xf32> -> vector<2x8x8xf32>
    "tpu.trace_stop"() : () -> ()
    %36 = arith.addf %35, %9 : vector<2x8x8xf32>
    %cst_18 = arith.constant dense<0xFF800000> : vector<2x8xf32>
    %37 = vector.multi_reduction <maximumf>, %36, %cst_18 [2] : vector<2x8x8xf32> to vector<2x8xf32>
    %38 = vector.shape_cast %37 : vector<2x8xf32> to vector<2x8x1xf32>
    %39 = vector.broadcast %38 : vector<2x8x1xf32> to vector<2x8x8xf32>
    %40 = arith.subf %36, %39 : vector<2x8x8xf32>
    %41 = math.exp %40 : vector<2x8x8xf32>
    %cst_19 = arith.constant dense<0.000000e+00> : vector<2x8xf32>
    %42 = vector.multi_reduction <add>, %41, %cst_19 [2] : vector<2x8x8xf32> to vector<2x8xf32>
    %43 = vector.shape_cast %42 : vector<2x8xf32> to vector<2x8x1xf32>
    %44 = tpu.reciprocal %43 {approx = true} : vector<2x8x1xf32> -> vector<2x8x1xf32>
    %45 = vector.broadcast %44 : vector<2x8x1xf32> to vector<2x8x8xf32>
    %46 = arith.mulf %41, %45 : vector<2x8x8xf32>
    "tpu.trace_start"() <{level = 10 : i32, message = "bts,bsd->btd"}> : () -> ()
    %cst_20 = arith.constant dense<0.000000e+00> : vector<2x8x8xf32>
    %47 = tpu.matmul %46, %34, %cst_20 {dimension_numbers = #tpu.dot_dimension_numbers<[2], [1], [1], [2], [0, 0, 0, 1, 1, 2], [0], [0]>} : vector<2x8x8xf32>, vector<2x8x8xf32>, vector<2x8x8xf32> -> vector<2x8x8xf32>
    "tpu.trace_stop"() : () -> ()
    %48 = vector.shape_cast %47 : vector<2x8x8xf32> to vector<16x8xf32>
    %49 = vector.extract_strided_slice %26 {offsets = [0, 0], sizes = [8, 32], strides = [1, 1]} : vector<32x32xf32> to vector<8x32xf32>
    %cst_21 = arith.constant dense<0.000000e+00> : vector<16x32xf32>
    %50 = tpu.matmul %48, %49, %cst_21 {dimension_numbers = #tpu.dot_dimension_numbers<[1], [0], [0], [1], [0, 0, 1, 1], [], []>} : vector<16x8xf32>, vector<8x32xf32>, vector<16x32xf32> -> vector<16x32xf32>
    %51 = arith.addf %28, %50 : vector<16x32xf32>
    %52 = vector.extract_strided_slice %23 {offsets = [0, 8], sizes = [16, 8], strides = [1, 1]} : vector<16x32xf32> to vector<16x8xf32>
    %53 = vector.shape_cast %52 : vector<16x8xf32> to vector<2x8x8xf32>
    %54 = vector.extract_strided_slice %24 {offsets = [0, 8], sizes = [16, 8], strides = [1, 1]} : vector<16x32xf32> to vector<16x8xf32>
    %55 = vector.shape_cast %54 : vector<16x8xf32> to vector<2x8x8xf32>
    %56 = vector.extract_strided_slice %25 {offsets = [0, 8], sizes = [16, 8], strides = [1, 1]} : vector<16x32xf32> to vector<16x8xf32>
    %57 = vector.shape_cast %56 : vector<16x8xf32> to vector<2x8x8xf32>
    "tpu.trace_start"() <{level = 10 : i32, message = "btd,bsd->bts"}> : () -> ()
    %cst_22 = arith.constant dense<0.000000e+00> : vector<2x8x8xf32>
    %58 = tpu.matmul %53, %55, %cst_22 {dimension_numbers = #tpu.dot_dimension_numbers<[2], [2], [1], [1], [0, 0, 0, 1, 1, 1], [0], [0]>} : vector<2x8x8xf32>, vector<2x8x8xf32>, vector<2x8x8xf32> -> vector<2x8x8xf32>
    "tpu.trace_stop"() : () -> ()
    %59 = arith.addf %58, %9 : vector<2x8x8xf32>
    %cst_23 = arith.constant dense<0xFF800000> : vector<2x8xf32>
    %60 = vector.multi_reduction <maximumf>, %59, %cst_23 [2] : vector<2x8x8xf32> to vector<2x8xf32>
    %61 = vector.shape_cast %60 : vector<2x8xf32> to vector<2x8x1xf32>
    %62 = vector.broadcast %61 : vector<2x8x1xf32> to vector<2x8x8xf32>
    %63 = arith.subf %59, %62 : vector<2x8x8xf32>
    %64 = math.exp %63 : vector<2x8x8xf32>
    %cst_24 = arith.constant dense<0.000000e+00> : vector<2x8xf32>
    %65 = vector.multi_reduction <add>, %64, %cst_24 [2] : vector<2x8x8xf32> to vector<2x8xf32>
    %66 = vector.shape_cast %65 : vector<2x8xf32> to vector<2x8x1xf32>
    %67 = tpu.reciprocal %66 {approx = true} : vector<2x8x1xf32> -> vector<2x8x1xf32>
    %68 = vector.broadcast %67 : vector<2x8x1xf32> to vector<2x8x8xf32>
    %69 = arith.mulf %64, %68 : vector<2x8x8xf32>
    "tpu.trace_start"() <{level = 10 : i32, message = "bts,bsd->btd"}> : () -> ()
    %cst_25 = arith.constant dense<0.000000e+00> : vector<2x8x8xf32>
    %70 = tpu.matmul %69, %57, %cst_25 {dimension_numbers = #tpu.dot_dimension_numbers<[2], [1], [1], [2], [0, 0, 0, 1, 1, 2], [0], [0]>} : vector<2x8x8xf32>, vector<2x8x8xf32>, vector<2x8x8xf32> -> vector<2x8x8xf32>
    "tpu.trace_stop"() : () -> ()
    %71 = vector.shape_cast %70 : vector<2x8x8xf32> to vector<16x8xf32>
    %72 = vector.extract_strided_slice %26 {offsets = [8, 0], sizes = [8, 32], strides = [1, 1]} : vector<32x32xf32> to vector<8x32xf32>
    %cst_26 = arith.constant dense<0.000000e+00> : vector<16x32xf32>
    %73 = tpu.matmul %71, %72, %cst_26 {dimension_numbers = #tpu.dot_dimension_numbers<[1], [0], [0], [1], [0, 0, 1, 1], [], []>} : vector<16x8xf32>, vector<8x32xf32>, vector<16x32xf32> -> vector<16x32xf32>
    %74 = arith.addf %51, %73 : vector<16x32xf32>
    %75 = vector.extract_strided_slice %23 {offsets = [0, 16], sizes = [16, 8], strides = [1, 1]} : vector<16x32xf32> to vector<16x8xf32>
    %76 = vector.shape_cast %75 : vector<16x8xf32> to vector<2x8x8xf32>
    %77 = vector.extract_strided_slice %24 {offsets = [0, 16], sizes = [16, 8], strides = [1, 1]} : vector<16x32xf32> to vector<16x8xf32>
    %78 = vector.shape_cast %77 : vector<16x8xf32> to vector<2x8x8xf32>
    %79 = vector.extract_strided_slice %25 {offsets = [0, 16], sizes = [16, 8], strides = [1, 1]} : vector<16x32xf32> to vector<16x8xf32>
    %80 = vector.shape_cast %79 : vector<16x8xf32> to vector<2x8x8xf32>
    "tpu.trace_start"() <{level = 10 : i32, message = "btd,bsd->bts"}> : () -> ()
    %cst_27 = arith.constant dense<0.000000e+00> : vector<2x8x8xf32>
    %81 = tpu.matmul %76, %78, %cst_27 {dimension_numbers = #tpu.dot_dimension_numbers<[2], [2], [1], [1], [0, 0, 0, 1, 1, 1], [0], [0]>} : vector<2x8x8xf32>, vector<2x8x8xf32>, vector<2x8x8xf32> -> vector<2x8x8xf32>
    "tpu.trace_stop"() : () -> ()
    %82 = arith.addf %81, %9 : vector<2x8x8xf32>
    %cst_28 = arith.constant dense<0xFF800000> : vector<2x8xf32>
    %83 = vector.multi_reduction <maximumf>, %82, %cst_28 [2] : vector<2x8x8xf32> to vector<2x8xf32>
    %84 = vector.shape_cast %83 : vector<2x8xf32> to vector<2x8x1xf32>
    %85 = vector.broadcast %84 : vector<2x8x1xf32> to vector<2x8x8xf32>
    %86 = arith.subf %82, %85 : vector<2x8x8xf32>
    %87 = math.exp %86 : vector<2x8x8xf32>
    %cst_29 = arith.constant dense<0.000000e+00> : vector<2x8xf32>
    %88 = vector.multi_reduction <add>, %87, %cst_29 [2] : vector<2x8x8xf32> to vector<2x8xf32>
    %89 = vector.shape_cast %88 : vector<2x8xf32> to vector<2x8x1xf32>
    %90 = tpu.reciprocal %89 {approx = true} : vector<2x8x1xf32> -> vector<2x8x1xf32>
    %91 = vector.broadcast %90 : vector<2x8x1xf32> to vector<2x8x8xf32>
    %92 = arith.mulf %87, %91 : vector<2x8x8xf32>
    "tpu.trace_start"() <{level = 10 : i32, message = "bts,bsd->btd"}> : () -> ()
    %cst_30 = arith.constant dense<0.000000e+00> : vector<2x8x8xf32>
    %93 = tpu.matmul %92, %80, %cst_30 {dimension_numbers = #tpu.dot_dimension_numbers<[2], [1], [1], [2], [0, 0, 0, 1, 1, 2], [0], [0]>} : vector<2x8x8xf32>, vector<2x8x8xf32>, vector<2x8x8xf32> -> vector<2x8x8xf32>
    "tpu.trace_stop"() : () -> ()
    %94 = vector.shape_cast %93 : vector<2x8x8xf32> to vector<16x8xf32>
    %95 = vector.extract_strided_slice %26 {offsets = [16, 0], sizes = [8, 32], strides = [1, 1]} : vector<32x32xf32> to vector<8x32xf32>
    %cst_31 = arith.constant dense<0.000000e+00> : vector<16x32xf32>
    %96 = tpu.matmul %94, %95, %cst_31 {dimension_numbers = #tpu.dot_dimension_numbers<[1], [0], [0], [1], [0, 0, 1, 1], [], []>} : vector<16x8xf32>, vector<8x32xf32>, vector<16x32xf32> -> vector<16x32xf32>
    %97 = arith.addf %74, %96 : vector<16x32xf32>
    %98 = vector.extract_strided_slice %23 {offsets = [0, 24], sizes = [16, 8], strides = [1, 1]} : vector<16x32xf32> to vector<16x8xf32>
    %99 = vector.shape_cast %98 : vector<16x8xf32> to vector<2x8x8xf32>
    %100 = vector.extract_strided_slice %24 {offsets = [0, 24], sizes = [16, 8], strides = [1, 1]} : vector<16x32xf32> to vector<16x8xf32>
    %101 = vector.shape_cast %100 : vector<16x8xf32> to vector<2x8x8xf32>
    %102 = vector.extract_strided_slice %25 {offsets = [0, 24], sizes = [16, 8], strides = [1, 1]} : vector<16x32xf32> to vector<16x8xf32>
    %103 = vector.shape_cast %102 : vector<16x8xf32> to vector<2x8x8xf32>
    "tpu.trace_start"() <{level = 10 : i32, message = "btd,bsd->bts"}> : () -> ()
    %cst_32 = arith.constant dense<0.000000e+00> : vector<2x8x8xf32>
    %104 = tpu.matmul %99, %101, %cst_32 {dimension_numbers = #tpu.dot_dimension_numbers<[2], [2], [1], [1], [0, 0, 0, 1, 1, 1], [0], [0]>} : vector<2x8x8xf32>, vector<2x8x8xf32>, vector<2x8x8xf32> -> vector<2x8x8xf32>
    "tpu.trace_stop"() : () -> ()
    %105 = arith.addf %104, %9 : vector<2x8x8xf32>
    %cst_33 = arith.constant dense<0xFF800000> : vector<2x8xf32>
    %106 = vector.multi_reduction <maximumf>, %105, %cst_33 [2] : vector<2x8x8xf32> to vector<2x8xf32>
    %107 = vector.shape_cast %106 : vector<2x8xf32> to vector<2x8x1xf32>
    %108 = vector.broadcast %107 : vector<2x8x1xf32> to vector<2x8x8xf32>
    %109 = arith.subf %105, %108 : vector<2x8x8xf32>
    %110 = math.exp %109 : vector<2x8x8xf32>
    %cst_34 = arith.constant dense<0.000000e+00> : vector<2x8xf32>
    %111 = vector.multi_reduction <add>, %110, %cst_34 [2] : vector<2x8x8xf32> to vector<2x8xf32>
    %112 = vector.shape_cast %111 : vector<2x8xf32> to vector<2x8x1xf32>
    %113 = tpu.reciprocal %112 {approx = true} : vector<2x8x1xf32> -> vector<2x8x1xf32>
    %114 = vector.broadcast %113 : vector<2x8x1xf32> to vector<2x8x8xf32>
    %115 = arith.mulf %110, %114 : vector<2x8x8xf32>
    "tpu.trace_start"() <{level = 10 : i32, message = "bts,bsd->btd"}> : () -> ()
    %cst_35 = arith.constant dense<0.000000e+00> : vector<2x8x8xf32>
    %116 = tpu.matmul %115, %103, %cst_35 {dimension_numbers = #tpu.dot_dimension_numbers<[2], [1], [1], [2], [0, 0, 0, 1, 1, 2], [0], [0]>} : vector<2x8x8xf32>, vector<2x8x8xf32>, vector<2x8x8xf32> -> vector<2x8x8xf32>
    "tpu.trace_stop"() : () -> ()
    %117 = vector.shape_cast %116 : vector<2x8x8xf32> to vector<16x8xf32>
    %118 = vector.extract_strided_slice %26 {offsets = [24, 0], sizes = [8, 32], strides = [1, 1]} : vector<32x32xf32> to vector<8x32xf32>
    %cst_36 = arith.constant dense<0.000000e+00> : vector<16x32xf32>
    %119 = tpu.matmul %117, %118, %cst_36 {dimension_numbers = #tpu.dot_dimension_numbers<[1], [0], [0], [1], [0, 0, 1, 1], [], []>} : vector<16x8xf32>, vector<8x32xf32>, vector<16x32xf32> -> vector<16x32xf32>
    %120 = arith.addf %97, %119 : vector<16x32xf32>
    %121 = vector.broadcast %27 : vector<1x32xf32> to vector<16x32xf32>
    %122 = arith.addf %120, %121 : vector<16x32xf32>
    %123 = arith.addf %122, %1 : vector<16x32xf32>
    %c72 = arith.constant 72 : index
    %c0_37 = arith.constant 0 : index
    %124 = vector.load %arg2[%c72, %c0_37] : memref<80x896xf32, #tpu.memory_space<vmem>>, vector<1x32xf32>
    %c72_38 = arith.constant 72 : index
    %c128_39 = arith.constant 128 : index
    %125 = vector.load %arg2[%c72_38, %c128_39] : memref<80x896xf32, #tpu.memory_space<vmem>>, vector<1x32xf32>
    %cst_40 = arith.constant dense<0.000000e+00> : vector<16xf32>
    %126 = vector.multi_reduction <add>, %123, %cst_40 [1] : vector<16x32xf32> to vector<16xf32>
    %127 = vector.shape_cast %126 : vector<16xf32> to vector<16x1xf32>
    %cst_41 = arith.constant 3.200000e+01 : f32
    %128 = vector.broadcast %cst_41 : f32 to vector<16x1xf32>
    %129 = arith.divf %127, %128 : vector<16x1xf32>
    %130 = vector.broadcast %129 : vector<16x1xf32> to vector<16x32xf32>
    %131 = arith.subf %123, %130 : vector<16x32xf32>
    %132 = arith.mulf %131, %131 : vector<16x32xf32>
    %cst_42 = arith.constant dense<0.000000e+00> : vector<16xf32>
    %133 = vector.multi_reduction <add>, %132, %cst_42 [1] : vector<16x32xf32> to vector<16xf32>
    %134 = vector.shape_cast %133 : vector<16xf32> to vector<16x1xf32>
    %cst_43 = arith.constant 3.200000e+01 : f32
    %135 = vector.broadcast %cst_43 : f32 to vector<16x1xf32>
    %136 = arith.divf %134, %135 : vector<16x1xf32>
    %cst_44 = arith.constant 9.99999974E-6 : f32
    %137 = vector.broadcast %cst_44 : f32 to vector<16x1xf32>
    %138 = arith.addf %136, %137 : vector<16x1xf32>
    %139 = math.rsqrt %138 : vector<16x1xf32>
    %140 = vector.broadcast %139 : vector<16x1xf32> to vector<16x32xf32>
    %141 = arith.mulf %131, %140 : vector<16x32xf32>
    %142 = vector.broadcast %124 : vector<1x32xf32> to vector<16x32xf32>
    %143 = arith.mulf %141, %142 : vector<16x32xf32>
    %144 = vector.broadcast %125 : vector<1x32xf32> to vector<16x32xf32>
    %145 = arith.addf %143, %144 : vector<16x32xf32>
    %c0_45 = arith.constant 0 : index
    %c256 = arith.constant 256 : index
    %146 = vector.load %arg2[%c0_45, %c256] : memref<80x896xf32, #tpu.memory_space<vmem>>, vector<32x32xf32>
    %cst_46 = arith.constant dense<0.000000e+00> : vector<16x32xf32>
    %147 = tpu.matmul %145, %146, %cst_46 {dimension_numbers = #tpu.dot_dimension_numbers<[1], [0], [0], [1], [0, 0, 1, 1], [], []>} : vector<16x32xf32>, vector<32x32xf32>, vector<16x32xf32> -> vector<16x32xf32>
    %c64_47 = arith.constant 64 : index
    %c256_48 = arith.constant 256 : index
    %148 = vector.load %arg2[%c64_47, %c256_48] : memref<80x896xf32, #tpu.memory_space<vmem>>, vector<1x32xf32>
    %149 = vector.broadcast %148 : vector<1x32xf32> to vector<16x32xf32>
    %150 = arith.addf %147, %149 : vector<16x32xf32>
    %cst_49 = arith.constant 0.353553385 : f32
    %151 = vector.broadcast %cst_49 : f32 to vector<16x32xf32>
    %152 = arith.mulf %150, %151 : vector<16x32xf32>
    %c0_50 = arith.constant 0 : index
    %c384 = arith.constant 384 : index
    %153 = vector.load %arg2[%c0_50, %c384] : memref<80x896xf32, #tpu.memory_space<vmem>>, vector<32x64xf32>
    %cst_51 = arith.constant dense<0.000000e+00> : vector<32x64xf32>
    %154 = tpu.matmul %3, %153, %cst_51 {dimension_numbers = #tpu.dot_dimension_numbers<[1], [0], [0], [1], [0, 0, 1, 1], [], []>} : vector<32x32xf32>, vector<32x64xf32>, vector<32x64xf32> -> vector<32x64xf32>
    %c64_52 = arith.constant 64 : index
    %c384_53 = arith.constant 384 : index
    %155 = vector.load %arg2[%c64_52, %c384_53] : memref<80x896xf32, #tpu.memory_space<vmem>>, vector<1x64xf32>
    %156 = vector.broadcast %155 : vector<1x64xf32> to vector<32x64xf32>
    %157 = arith.addf %154, %156 : vector<32x64xf32>
    %158 = vector.extract_strided_slice %157 {offsets = [0, 0], sizes = [32, 32], strides = [1, 1]} : vector<32x64xf32> to vector<32x32xf32>
    %159 = vector.extract_strided_slice %157 {offsets = [0, 32], sizes = [32, 32], strides = [1, 1]} : vector<32x64xf32> to vector<32x32xf32>
    %c0_54 = arith.constant 0 : index
    %c512 = arith.constant 512 : index
    %160 = vector.load %arg2[%c0_54, %c512] : memref<80x896xf32, #tpu.memory_space<vmem>>, vector<32x32xf32>
    %c64_55 = arith.constant 64 : index
    %c512_56 = arith.constant 512 : index
    %161 = vector.load %arg2[%c64_55, %c512_56] : memref<80x896xf32, #tpu.memory_space<vmem>>, vector<1x32xf32>
    %cst_57 = arith.constant 0.000000e+00 : f32
    %162 = vector.broadcast %cst_57 : f32 to vector<16x32xf32>
    %163 = vector.extract_strided_slice %152 {offsets = [0, 0], sizes = [16, 8], strides = [1, 1]} : vector<16x32xf32> to vector<16x8xf32>
    %164 = vector.shape_cast %163 : vector<16x8xf32> to vector<2x8x8xf32>
    %165 = vector.extract_strided_slice %158 {offsets = [0, 0], sizes = [32, 8], strides = [1, 1]} : vector<32x32xf32> to vector<32x8xf32>
    %166 = vector.shape_cast %165 : vector<32x8xf32> to vector<2x16x8xf32>
    %167 = vector.extract_strided_slice %159 {offsets = [0, 0], sizes = [32, 8], strides = [1, 1]} : vector<32x32xf32> to vector<32x8xf32>
    %168 = vector.shape_cast %167 : vector<32x8xf32> to vector<2x16x8xf32>
    "tpu.trace_start"() <{level = 10 : i32, message = "btd,bsd->bts"}> : () -> ()
    %cst_58 = arith.constant dense<0.000000e+00> : vector<2x8x16xf32>
    %169 = tpu.matmul %164, %166, %cst_58 {dimension_numbers = #tpu.dot_dimension_numbers<[2], [2], [1], [1], [0, 0, 0, 1, 1, 1], [0], [0]>} : vector<2x8x8xf32>, vector<2x16x8xf32>, vector<2x8x16xf32> -> vector<2x8x16xf32>
    "tpu.trace_stop"() : () -> ()
    %170 = arith.addf %169, %15 : vector<2x8x16xf32>
    %cst_59 = arith.constant dense<0xFF800000> : vector<2x8xf32>
    %171 = vector.multi_reduction <maximumf>, %170, %cst_59 [2] : vector<2x8x16xf32> to vector<2x8xf32>
    %172 = vector.shape_cast %171 : vector<2x8xf32> to vector<2x8x1xf32>
    %173 = vector.broadcast %172 : vector<2x8x1xf32> to vector<2x8x16xf32>
    %174 = arith.subf %170, %173 : vector<2x8x16xf32>
    %175 = math.exp %174 : vector<2x8x16xf32>
    %cst_60 = arith.constant dense<0.000000e+00> : vector<2x8xf32>
    %176 = vector.multi_reduction <add>, %175, %cst_60 [2] : vector<2x8x16xf32> to vector<2x8xf32>
    %177 = vector.shape_cast %176 : vector<2x8xf32> to vector<2x8x1xf32>
    %178 = vector.broadcast %177 : vector<2x8x1xf32> to vector<2x8x16xf32>
    %179 = arith.divf %175, %178 : vector<2x8x16xf32>
    "tpu.trace_start"() <{level = 10 : i32, message = "bts,bsd->btd"}> : () -> ()
    %cst_61 = arith.constant dense<0.000000e+00> : vector<2x8x8xf32>
    %180 = tpu.matmul %179, %168, %cst_61 {dimension_numbers = #tpu.dot_dimension_numbers<[2], [1], [1], [2], [0, 0, 0, 1, 1, 2], [0], [0]>} : vector<2x8x16xf32>, vector<2x16x8xf32>, vector<2x8x8xf32> -> vector<2x8x8xf32>
    "tpu.trace_stop"() : () -> ()
    %181 = vector.shape_cast %180 : vector<2x8x8xf32> to vector<16x8xf32>
    %182 = vector.extract_strided_slice %160 {offsets = [0, 0], sizes = [8, 32], strides = [1, 1]} : vector<32x32xf32> to vector<8x32xf32>
    %cst_62 = arith.constant dense<0.000000e+00> : vector<16x32xf32>
    %183 = tpu.matmul %181, %182, %cst_62 {dimension_numbers = #tpu.dot_dimension_numbers<[1], [0], [0], [1], [0, 0, 1, 1], [], []>} : vector<16x8xf32>, vector<8x32xf32>, vector<16x32xf32> -> vector<16x32xf32>
    %184 = arith.addf %162, %183 : vector<16x32xf32>
    %185 = vector.shape_cast %179 : vector<2x8x16xf32> to vector<16x16xf32>
    %186 = vector.extract_strided_slice %152 {offsets = [0, 8], sizes = [16, 8], strides = [1, 1]} : vector<16x32xf32> to vector<16x8xf32>
    %187 = vector.shape_cast %186 : vector<16x8xf32> to vector<2x8x8xf32>
    %188 = vector.extract_strided_slice %158 {offsets = [0, 8], sizes = [32, 8], strides = [1, 1]} : vector<32x32xf32> to vector<32x8xf32>
    %189 = vector.shape_cast %188 : vector<32x8xf32> to vector<2x16x8xf32>
    %190 = vector.extract_strided_slice %159 {offsets = [0, 8], sizes = [32, 8], strides = [1, 1]} : vector<32x32xf32> to vector<32x8xf32>
    %191 = vector.shape_cast %190 : vector<32x8xf32> to vector<2x16x8xf32>
    "tpu.trace_start"() <{level = 10 : i32, message = "btd,bsd->bts"}> : () -> ()
    %cst_63 = arith.constant dense<0.000000e+00> : vector<2x8x16xf32>
    %192 = tpu.matmul %187, %189, %cst_63 {dimension_numbers = #tpu.dot_dimension_numbers<[2], [2], [1], [1], [0, 0, 0, 1, 1, 1], [0], [0]>} : vector<2x8x8xf32>, vector<2x16x8xf32>, vector<2x8x16xf32> -> vector<2x8x16xf32>
    "tpu.trace_stop"() : () -> ()
    %193 = arith.addf %192, %15 : vector<2x8x16xf32>
    %cst_64 = arith.constant dense<0xFF800000> : vector<2x8xf32>
    %194 = vector.multi_reduction <maximumf>, %193, %cst_64 [2] : vector<2x8x16xf32> to vector<2x8xf32>
    %195 = vector.shape_cast %194 : vector<2x8xf32> to vector<2x8x1xf32>
    %196 = vector.broadcast %195 : vector<2x8x1xf32> to vector<2x8x16xf32>
    %197 = arith.subf %193, %196 : vector<2x8x16xf32>
    %198 = math.exp %197 : vector<2x8x16xf32>
    %cst_65 = arith.constant dense<0.000000e+00> : vector<2x8xf32>
    %199 = vector.multi_reduction <add>, %198, %cst_65 [2] : vector<2x8x16xf32> to vector<2x8xf32>
    %200 = vector.shape_cast %199 : vector<2x8xf32> to vector<2x8x1xf32>
    %201 = vector.broadcast %200 : vector<2x8x1xf32> to vector<2x8x16xf32>
    %202 = arith.divf %198, %201 : vector<2x8x16xf32>
    "tpu.trace_start"() <{level = 10 : i32, message = "bts,bsd->btd"}> : () -> ()
    %cst_66 = arith.constant dense<0.000000e+00> : vector<2x8x8xf32>
    %203 = tpu.matmul %202, %191, %cst_66 {dimension_numbers = #tpu.dot_dimension_numbers<[2], [1], [1], [2], [0, 0, 0, 1, 1, 2], [0], [0]>} : vector<2x8x16xf32>, vector<2x16x8xf32>, vector<2x8x8xf32> -> vector<2x8x8xf32>
    "tpu.trace_stop"() : () -> ()
    %204 = vector.shape_cast %203 : vector<2x8x8xf32> to vector<16x8xf32>
    %205 = vector.extract_strided_slice %160 {offsets = [8, 0], sizes = [8, 32], strides = [1, 1]} : vector<32x32xf32> to vector<8x32xf32>
    %cst_67 = arith.constant dense<0.000000e+00> : vector<16x32xf32>
    %206 = tpu.matmul %204, %205, %cst_67 {dimension_numbers = #tpu.dot_dimension_numbers<[1], [0], [0], [1], [0, 0, 1, 1], [], []>} : vector<16x8xf32>, vector<8x32xf32>, vector<16x32xf32> -> vector<16x32xf32>
    %207 = arith.addf %184, %206 : vector<16x32xf32>
    %208 = vector.shape_cast %202 : vector<2x8x16xf32> to vector<16x16xf32>
    %209 = vector.extract_strided_slice %152 {offsets = [0, 16], sizes = [16, 8], strides = [1, 1]} : vector<16x32xf32> to vector<16x8xf32>
    %210 = vector.shape_cast %209 : vector<16x8xf32> to vector<2x8x8xf32>
    %211 = vector.extract_strided_slice %158 {offsets = [0, 16], sizes = [32, 8], strides = [1, 1]} : vector<32x32xf32> to vector<32x8xf32>
    %212 = vector.shape_cast %211 : vector<32x8xf32> to vector<2x16x8xf32>
    %213 = vector.extract_strided_slice %159 {offsets = [0, 16], sizes = [32, 8], strides = [1, 1]} : vector<32x32xf32> to vector<32x8xf32>
    %214 = vector.shape_cast %213 : vector<32x8xf32> to vector<2x16x8xf32>
    "tpu.trace_start"() <{level = 10 : i32, message = "btd,bsd->bts"}> : () -> ()
    %cst_68 = arith.constant dense<0.000000e+00> : vector<2x8x16xf32>
    %215 = tpu.matmul %210, %212, %cst_68 {dimension_numbers = #tpu.dot_dimension_numbers<[2], [2], [1], [1], [0, 0, 0, 1, 1, 1], [0], [0]>} : vector<2x8x8xf32>, vector<2x16x8xf32>, vector<2x8x16xf32> -> vector<2x8x16xf32>
    "tpu.trace_stop"() : () -> ()
    %216 = arith.addf %215, %15 : vector<2x8x16xf32>
    %cst_69 = arith.constant dense<0xFF800000> : vector<2x8xf32>
    %217 = vector.multi_reduction <maximumf>, %216, %cst_69 [2] : vector<2x8x16xf32> to vector<2x8xf32>
    %218 = vector.shape_cast %217 : vector<2x8xf32> to vector<2x8x1xf32>
    %219 = vector.broadcast %218 : vector<2x8x1xf32> to vector<2x8x16xf32>
    %220 = arith.subf %216, %219 : vector<2x8x16xf32>
    %221 = math.exp %220 : vector<2x8x16xf32>
    %cst_70 = arith.constant dense<0.000000e+00> : vector<2x8xf32>
    %222 = vector.multi_reduction <add>, %221, %cst_70 [2] : vector<2x8x16xf32> to vector<2x8xf32>
    %223 = vector.shape_cast %222 : vector<2x8xf32> to vector<2x8x1xf32>
    %224 = vector.broadcast %223 : vector<2x8x1xf32> to vector<2x8x16xf32>
    %225 = arith.divf %221, %224 : vector<2x8x16xf32>
    "tpu.trace_start"() <{level = 10 : i32, message = "bts,bsd->btd"}> : () -> ()
    %cst_71 = arith.constant dense<0.000000e+00> : vector<2x8x8xf32>
    %226 = tpu.matmul %225, %214, %cst_71 {dimension_numbers = #tpu.dot_dimension_numbers<[2], [1], [1], [2], [0, 0, 0, 1, 1, 2], [0], [0]>} : vector<2x8x16xf32>, vector<2x16x8xf32>, vector<2x8x8xf32> -> vector<2x8x8xf32>
    "tpu.trace_stop"() : () -> ()
    %227 = vector.shape_cast %226 : vector<2x8x8xf32> to vector<16x8xf32>
    %228 = vector.extract_strided_slice %160 {offsets = [16, 0], sizes = [8, 32], strides = [1, 1]} : vector<32x32xf32> to vector<8x32xf32>
    %cst_72 = arith.constant dense<0.000000e+00> : vector<16x32xf32>
    %229 = tpu.matmul %227, %228, %cst_72 {dimension_numbers = #tpu.dot_dimension_numbers<[1], [0], [0], [1], [0, 0, 1, 1], [], []>} : vector<16x8xf32>, vector<8x32xf32>, vector<16x32xf32> -> vector<16x32xf32>
    %230 = arith.addf %207, %229 : vector<16x32xf32>
    %231 = vector.shape_cast %225 : vector<2x8x16xf32> to vector<16x16xf32>
    %232 = vector.extract_strided_slice %152 {offsets = [0, 24], sizes = [16, 8], strides = [1, 1]} : vector<16x32xf32> to vector<16x8xf32>
    %233 = vector.shape_cast %232 : vector<16x8xf32> to vector<2x8x8xf32>
    %234 = vector.extract_strided_slice %158 {offsets = [0, 24], sizes = [32, 8], strides = [1, 1]} : vector<32x32xf32> to vector<32x8xf32>
    %235 = vector.shape_cast %234 : vector<32x8xf32> to vector<2x16x8xf32>
    %236 = vector.extract_strided_slice %159 {offsets = [0, 24], sizes = [32, 8], strides = [1, 1]} : vector<32x32xf32> to vector<32x8xf32>
    %237 = vector.shape_cast %236 : vector<32x8xf32> to vector<2x16x8xf32>
    "tpu.trace_start"() <{level = 10 : i32, message = "btd,bsd->bts"}> : () -> ()
    %cst_73 = arith.constant dense<0.000000e+00> : vector<2x8x16xf32>
    %238 = tpu.matmul %233, %235, %cst_73 {dimension_numbers = #tpu.dot_dimension_numbers<[2], [2], [1], [1], [0, 0, 0, 1, 1, 1], [0], [0]>} : vector<2x8x8xf32>, vector<2x16x8xf32>, vector<2x8x16xf32> -> vector<2x8x16xf32>
    "tpu.trace_stop"() : () -> ()
    %239 = arith.addf %238, %15 : vector<2x8x16xf32>
    %cst_74 = arith.constant dense<0xFF800000> : vector<2x8xf32>
    %240 = vector.multi_reduction <maximumf>, %239, %cst_74 [2] : vector<2x8x16xf32> to vector<2x8xf32>
    %241 = vector.shape_cast %240 : vector<2x8xf32> to vector<2x8x1xf32>
    %242 = vector.broadcast %241 : vector<2x8x1xf32> to vector<2x8x16xf32>
    %243 = arith.subf %239, %242 : vector<2x8x16xf32>
    %244 = math.exp %243 : vector<2x8x16xf32>
    %cst_75 = arith.constant dense<0.000000e+00> : vector<2x8xf32>
    %245 = vector.multi_reduction <add>, %244, %cst_75 [2] : vector<2x8x16xf32> to vector<2x8xf32>
    %246 = vector.shape_cast %245 : vector<2x8xf32> to vector<2x8x1xf32>
    %247 = vector.broadcast %246 : vector<2x8x1xf32> to vector<2x8x16xf32>
    %248 = arith.divf %244, %247 : vector<2x8x16xf32>
    "tpu.trace_start"() <{level = 10 : i32, message = "bts,bsd->btd"}> : () -> ()
    %cst_76 = arith.constant dense<0.000000e+00> : vector<2x8x8xf32>
    %249 = tpu.matmul %248, %237, %cst_76 {dimension_numbers = #tpu.dot_dimension_numbers<[2], [1], [1], [2], [0, 0, 0, 1, 1, 2], [0], [0]>} : vector<2x8x16xf32>, vector<2x16x8xf32>, vector<2x8x8xf32> -> vector<2x8x8xf32>
    "tpu.trace_stop"() : () -> ()
    %250 = vector.shape_cast %249 : vector<2x8x8xf32> to vector<16x8xf32>
    %251 = vector.extract_strided_slice %160 {offsets = [24, 0], sizes = [8, 32], strides = [1, 1]} : vector<32x32xf32> to vector<8x32xf32>
    %cst_77 = arith.constant dense<0.000000e+00> : vector<16x32xf32>
    %252 = tpu.matmul %250, %251, %cst_77 {dimension_numbers = #tpu.dot_dimension_numbers<[1], [0], [0], [1], [0, 0, 1, 1], [], []>} : vector<16x8xf32>, vector<8x32xf32>, vector<16x32xf32> -> vector<16x32xf32>
    %253 = arith.addf %230, %252 : vector<16x32xf32>
    %254 = vector.shape_cast %248 : vector<2x8x16xf32> to vector<16x16xf32>
    %255 = vector.broadcast %161 : vector<1x32xf32> to vector<16x32xf32>
    %256 = arith.addf %253, %255 : vector<16x32xf32>
    %257 = arith.addf %256, %145 : vector<16x32xf32>
    %c72_78 = arith.constant 72 : index
    %c256_79 = arith.constant 256 : index
    %258 = vector.load %arg2[%c72_78, %c256_79] : memref<80x896xf32, #tpu.memory_space<vmem>>, vector<1x32xf32>
    %c72_80 = arith.constant 72 : index
    %c384_81 = arith.constant 384 : index
    %259 = vector.load %arg2[%c72_80, %c384_81] : memref<80x896xf32, #tpu.memory_space<vmem>>, vector<1x32xf32>
    %cst_82 = arith.constant dense<0.000000e+00> : vector<16xf32>
    %260 = vector.multi_reduction <add>, %257, %cst_82 [1] : vector<16x32xf32> to vector<16xf32>
    %261 = vector.shape_cast %260 : vector<16xf32> to vector<16x1xf32>
    %cst_83 = arith.constant 3.200000e+01 : f32
    %262 = vector.broadcast %cst_83 : f32 to vector<16x1xf32>
    %263 = arith.divf %261, %262 : vector<16x1xf32>
    %264 = vector.broadcast %263 : vector<16x1xf32> to vector<16x32xf32>
    %265 = arith.subf %257, %264 : vector<16x32xf32>
    %266 = arith.mulf %265, %265 : vector<16x32xf32>
    %cst_84 = arith.constant dense<0.000000e+00> : vector<16xf32>
    %267 = vector.multi_reduction <add>, %266, %cst_84 [1] : vector<16x32xf32> to vector<16xf32>
    %268 = vector.shape_cast %267 : vector<16xf32> to vector<16x1xf32>
    %cst_85 = arith.constant 3.200000e+01 : f32
    %269 = vector.broadcast %cst_85 : f32 to vector<16x1xf32>
    %270 = arith.divf %268, %269 : vector<16x1xf32>
    %cst_86 = arith.constant 9.99999974E-6 : f32
    %271 = vector.broadcast %cst_86 : f32 to vector<16x1xf32>
    %272 = arith.addf %270, %271 : vector<16x1xf32>
    %273 = math.rsqrt %272 : vector<16x1xf32>
    %274 = vector.broadcast %273 : vector<16x1xf32> to vector<16x32xf32>
    %275 = arith.mulf %265, %274 : vector<16x32xf32>
    %276 = vector.broadcast %258 : vector<1x32xf32> to vector<16x32xf32>
    %277 = arith.mulf %275, %276 : vector<16x32xf32>
    %278 = vector.broadcast %259 : vector<1x32xf32> to vector<16x32xf32>
    %279 = arith.addf %277, %278 : vector<16x32xf32>
    %c0_87 = arith.constant 0 : index
    %c640 = arith.constant 640 : index
    %280 = vector.load %arg2[%c0_87, %c640] : memref<80x896xf32, #tpu.memory_space<vmem>>, vector<32x64xf32>
    %cst_88 = arith.constant dense<0.000000e+00> : vector<16x64xf32>
    %281 = tpu.matmul %279, %280, %cst_88 {dimension_numbers = #tpu.dot_dimension_numbers<[1], [0], [0], [1], [0, 0, 1, 1], [], []>} : vector<16x32xf32>, vector<32x64xf32>, vector<16x64xf32> -> vector<16x64xf32>
    %c64_89 = arith.constant 64 : index
    %c640_90 = arith.constant 640 : index
    %282 = vector.load %arg2[%c64_89, %c640_90] : memref<80x896xf32, #tpu.memory_space<vmem>>, vector<1x64xf32>
    %283 = vector.broadcast %282 : vector<1x64xf32> to vector<16x64xf32>
    %284 = arith.addf %281, %283 : vector<16x64xf32>
    %cst_91 = arith.constant 0.000000e+00 : f32
    %285 = vector.broadcast %cst_91 : f32 to vector<16x64xf32>
    %286 = arith.maximumf %284, %285 : vector<16x64xf32>
    %c0_92 = arith.constant 0 : index
    %c768 = arith.constant 768 : index
    %287 = vector.load %arg2[%c0_92, %c768] : memref<80x896xf32, #tpu.memory_space<vmem>>, vector<64x32xf32>
    %cst_93 = arith.constant dense<0.000000e+00> : vector<16x32xf32>
    %288 = tpu.matmul %286, %287, %cst_93 {dimension_numbers = #tpu.dot_dimension_numbers<[1], [0], [0], [1], [0, 0, 1, 1], [], []>} : vector<16x64xf32>, vector<64x32xf32>, vector<16x32xf32> -> vector<16x32xf32>
    %c64_94 = arith.constant 64 : index
    %c768_95 = arith.constant 768 : index
    %289 = vector.load %arg2[%c64_94, %c768_95] : memref<80x896xf32, #tpu.memory_space<vmem>>, vector<1x32xf32>
    %290 = vector.broadcast %289 : vector<1x32xf32> to vector<16x32xf32>
    %291 = arith.addf %288, %290 : vector<16x32xf32>
    %292 = arith.addf %291, %279 : vector<16x32xf32>
    %c72_96 = arith.constant 72 : index
    %c512_97 = arith.constant 512 : index
    %293 = vector.load %arg2[%c72_96, %c512_97] : memref<80x896xf32, #tpu.memory_space<vmem>>, vector<1x32xf32>
    %c72_98 = arith.constant 72 : index
    %c640_99 = arith.constant 640 : index
    %294 = vector.load %arg2[%c72_98, %c640_99] : memref<80x896xf32, #tpu.memory_space<vmem>>, vector<1x32xf32>
    %cst_100 = arith.constant dense<0.000000e+00> : vector<16xf32>
    %295 = vector.multi_reduction <add>, %292, %cst_100 [1] : vector<16x32xf32> to vector<16xf32>
    %296 = vector.shape_cast %295 : vector<16xf32> to vector<16x1xf32>
    %cst_101 = arith.constant 3.200000e+01 : f32
    %297 = vector.broadcast %cst_101 : f32 to vector<16x1xf32>
    %298 = arith.divf %296, %297 : vector<16x1xf32>
    %299 = vector.broadcast %298 : vector<16x1xf32> to vector<16x32xf32>
    %300 = arith.subf %292, %299 : vector<16x32xf32>
    %301 = arith.mulf %300, %300 : vector<16x32xf32>
    %cst_102 = arith.constant dense<0.000000e+00> : vector<16xf32>
    %302 = vector.multi_reduction <add>, %301, %cst_102 [1] : vector<16x32xf32> to vector<16xf32>
    %303 = vector.shape_cast %302 : vector<16xf32> to vector<16x1xf32>
    %cst_103 = arith.constant 3.200000e+01 : f32
    %304 = vector.broadcast %cst_103 : f32 to vector<16x1xf32>
    %305 = arith.divf %303, %304 : vector<16x1xf32>
    %cst_104 = arith.constant 9.99999974E-6 : f32
    %306 = vector.broadcast %cst_104 : f32 to vector<16x1xf32>
    %307 = arith.addf %305, %306 : vector<16x1xf32>
    %308 = math.rsqrt %307 : vector<16x1xf32>
    %309 = vector.broadcast %308 : vector<16x1xf32> to vector<16x32xf32>
    %310 = arith.mulf %300, %309 : vector<16x32xf32>
    %311 = vector.broadcast %293 : vector<1x32xf32> to vector<16x32xf32>
    %312 = arith.mulf %310, %311 : vector<16x32xf32>
    %313 = vector.broadcast %294 : vector<1x32xf32> to vector<16x32xf32>
    %314 = arith.addf %312, %313 : vector<16x32xf32>
    %cst_105 = arith.constant 0.000000e+00 : f32
    %315 = vector.broadcast %cst_105 : f32 to vector<16x32xf32>
    %316 = tpu.concatenate %314, %185, %208, %231, %254, %315 in 1 : vector<16x32xf32>, vector<16x16xf32>, vector<16x16xf32>, vector<16x16xf32>, vector<16x16xf32>, vector<16x32xf32> -> vector<16x128xf32>
    %c0_106 = arith.constant 0 : index
    %c0_107 = arith.constant 0 : index
    %317 = vector.load %arg3[%c0_106, %c0_107] : memref<16x128xf32, #tpu.memory_space<vmem>>, vector<16x128xf32>
    tpu.vector_store %arg3[%c0_106, %c0_107], %316 {strides = array<i32>} : memref<16x128xf32, #tpu.memory_space<vmem>>, vector<16x128xf32>,
    return
  }
}

</mosaic_0001>

<bundles_post_ra>
// kernel: tpu_custom_call.1
= control target key start
LH: loop header
LB: loop body
LE: loop exit
PB: predicated region body
PF: predicated region fallthrough
CT: control target
= control target key end

     0   :  { %8 = vsyncpa [#allocation3], 0  ;;  %s5487_s0 = inlined_call_operand.hbm [shape: f32[2,8,32], index: 0, kind: input, shape index: {}]   ;;  %s5488_s1 = inlined_call_operand.hbm [shape: f32[2,16,32], index: 1, kind: input, shape index: {}]   ;;  %s5489_s2 = inlined_call_operand.hbm [shape: f32[80,896], index: 2, kind: input, shape index: {}]   ;;  %s5490_s3 = inlined_call_operand.hbm [shape: f32[16,128], index: 3, kind: output, shape index: {}]  }
   0x1   :  { %9 = vsyncpa [#allocation6], 0 }
   0x2   :  { %10 = vsyncpa [#allocation4], 0  ;;  %s4950_s12 = smov [#allocation5]   ;;  %s4951_s14 = smov [#allocation2]  }
   0x3   :  { %s28_s13 = sshll.u32 %s4950_s12, 4  ;;  %s16_s15 = sshll.u32 %s4951_s14, 4  ;;  %s29_s13 = int_to_ptr.vmem [resolvable:$true] %s28_s13  ;;  %s4992_s15 = int_to_ptr.vmem [resolvable:$true] %s16_s15 }
   0x4   :  { %s4856_s18 = scalar_lea.hbm %s5488_s1, 512 }
   0x5   :  { %p4857_p0 = scmp.ne.s32.totalorder %s5488_s1, %s4856_s18  ;;  %p4860_p1 = scmp.lt.u32.totalorder %s4856_s18, %s5488_s1 }
   0x7   :  { %p4862_p2 = pnand %p4860_p1, %p4857_p0 }
   0x9   :  { %4865 = shalt.err (!%p4862_p2)
}
   0xa   :  { %s4866_s23 = scalar_lea.vmem %s29_s13, 512  ;;  %p4871_p4 = scmp.lt.s32.totalorder %s29_s13, %s29_s13 }
   0xb   :  { %p4867_p3 = scmp.ne.s32.totalorder %s29_s13, %s4866_s23  ;;  %p4872_p5 = scmp.lt.s32.totalorder %s4866_s23, %s4866_s23 }
   0xd   :  { %p4873_p6 = por %p4872_p5, %p4871_p4 }
   0xf   :  { %p4874_p7 = pnand %p4873_p6, %p4867_p3 }
  0x11   :  { %4877 = shalt.err (!%p4874_p7)
}
  0x12   :  { %s4952_s24 = smov 128   ;;  %s4953_s25 = smov 8  }
  0x13   :  { %34 = dma.hbm_to_vmem [thread:$0]  %s5488_s1, 512, %s29_s13, [#allocation6], %s4952_s24, %s4952_s24, %s4953_s25  }
  0x14   :  { %s4878_s30 = scalar_lea.hbm %s5487_s0, 256 }
  0x15   :  { %p4879_p8 = scmp.ne.s32.totalorder %s5487_s0, %s4878_s30  ;;  %p4882_p9 = scmp.lt.u32.totalorder %s4878_s30, %s5487_s0 }
  0x17   :  { %p4884_p10 = pnand %p4882_p9, %p4879_p8 }
  0x19   :  { %4887 = shalt.err (!%p4884_p10)
}
  0x1a   :  { %s4888_s8 = scalar_lea.vmem %s4992_s15, 256  ;;  %p4893_p12 = scmp.lt.s32.totalorder %s4992_s15, %s4992_s15 }
  0x1b   :  { %p4889_p11 = scmp.ne.s32.totalorder %s4992_s15, %s4888_s8  ;;  %p4894_p13 = scmp.lt.s32.totalorder %s4888_s8, %s4888_s8 }
  0x1d   :  { %p4895_p0 = por %p4894_p13, %p4893_p12 }
  0x1f   :  { %p4896_p1 = pnand %p4895_p0, %p4889_p11 }
  0x21   :  { %4899 = shalt.err (!%p4896_p1)
}
  0x22   :  { %22 = dma.hbm_to_vmem [thread:$0]  %s5487_s0, 256, %s4992_s15, [#allocation3], %s4952_s24, %s4952_s24, %s4953_s25  }
  0x23   :  { %s4954_s10 = smov [#allocation7]   ;;  %s4900_s14 = scalar_lea.hbm %s5489_s2, 8960 }
  0x24   :  { %s40_s11 = sshll.u32 %s4954_s10, 4  ;;  %p4901_p2 = scmp.ne.s32.totalorder %s5489_s2, %s4900_s14  ;;  %s41_s11 = int_to_ptr.vmem [resolvable:$true] %s40_s11 }
  0x25   :  { %p4904_p3 = scmp.lt.u32.totalorder %s4900_s14, %s5489_s2 }
  0x27   :  { %p4906_p4 = pnand %p4904_p3, %p4901_p2 }
  0x29   :  { %4909 = shalt.err (!%p4906_p4)
}
  0x2a   :  { %s4910_s20 = scalar_lea.vmem %s41_s11, 8960  ;;  %p4915_p6 = scmp.lt.s32.totalorder %s41_s11, %s41_s11 }
  0x2b   :  { %p4911_p5 = scmp.ne.s32.totalorder %s41_s11, %s4910_s20  ;;  %p4916_p7 = scmp.lt.s32.totalorder %s4910_s20, %s4910_s20 }
  0x2d   :  { %p4917_p8 = por %p4916_p7, %p4915_p6 }
  0x2f   :  { %p4918_p9 = pnand %p4917_p8, %p4911_p5 }
  0x31   :  { %4921 = shalt.err (!%p4918_p9)
}
  0x32   :  { %s4955_s0 = smov 896   ;;  %s4956_s15 = smov 56  }
  0x33   :  { %46 = dma.hbm_to_vmem [thread:$0]  %s5489_s2, 8960, %s41_s11, [#allocation6], %s4955_s0, %s4955_s0, %s4956_s15  }
  0x34   :  { %4944 = dma.done.wait [#allocation3], 256  }
  0x35   :  { %4945 = vsyncadd [#allocation3], 4294967040 }
  0x36   :  { %4946 = dma.done.wait [#allocation6], 9472  }
  0x37   :  { %4947 = vsyncadd [#allocation6], 4294957824  ;;  %vm75_vm0 = vcmask 261120   ;;  %v70_v0 = vld [vmem:[#allocation7] sm:$0xff]  ;;  %v71_v1 = vld [vmem:[#allocation7 + $0x38] sm:$0xff]  ;;  %v4957_v8 = vmov 0.0   ;;  %v62_v19 = vlaneseq }
  0x38   :  { %v72_v2 = vld [vmem:[#allocation7 + $0x70] sm:$0xff]  ;;  %v4572_v3 = vpack.c.bf16 %v71_v1, %v70_v0  ;;  %v73_v4 = vld [vmem:[#allocation7 + $0xa8] sm:$0xff]  ;;  %v5046_v7 = vld [vmem:[#allocation2 + $0x8] sm:$0xff]  ;;  %4295 = vmatprep.subr.mxu0 %v4957_v8  ;;  %vm4958_vm1 = vmmov 0   ;;  %s4959_s2 = smov 96   ;;  %s4960_s23 = smov 64  }
  0x39   :  { %v5042_v5 = vld [vmem:[#allocation2] sm:$0xff]  ;;  %v4576_v6 = vpack.c.bf16 %v73_v4, %v72_v2  ;;  %4297 = vmatprep.mubr.msk.f32.mxu0 %vm4958_vm1, %v4957_v8  ;;  %v74_v9 = vld [vmem:[#allocation7 + $0x1c0] ss:$0 sm:$0xff]  ;;  %s4961_s26 = smov 120   ;;  %vm167_vm2 = vcmask 64512   ;;  %v63_v20 = vshrl.u32 %v62_v19, 7 }
  0x3a   :  { %4282 = vmatprep.mubr.msk.f32.mxu1 %vm75_vm0, %v5042_v5  ;;  %4573 = vmatprep.subr.bf16.mxu1 %v4572_v3  ;;  %v5087_v21 = vand.u32 127, %v62_v19  ;;  %s4962_s27 = smov 88   ;;  %s4963_s28 = smov 80   ;;  %vm5246_vm4 = vmpackc.low %vm167_vm2, %vm167_vm2  ;;  %vm2203_vm6 = vcmask 130048   ;;  %vm3877_vm7 = vcmask 523264   ;;  %vm4019_vm8 = vcmask 392192  }
  0x3b   :  { %4575 = vmatpush3.bf16.msra.mxu1 %v4572_v3  ;;  %s4964_s29 = smov 112   ;;  %s4965_s30 = smov 48   ;;  %vm4024_vm9 = vcmask 654336   ;;  %vm4027_vm10 = vcmask 785408  }
  0x3c   :  { %4577 = vmatprep.subr.bf16.mxu1 %v4576_v6  ;;  %vm66_vm3 = vcmp.gt.s32.totalorder %v5087_v21, %v63_v20  ;;  %s4966_s4 = smov 72   ;;  %s4967_s5 = smov 104   ;;  %vm68_vm5 = vcmp.ge.s32.totalorder %v5087_v21, 12 }
  0x3d   :  { %v5091_v22 = vsel %vm66_vm3, -1e+30, %v4957_v8  ;;  %s4968_s6 = smov 40   ;;  %s4970_s7 = smov 32  }
  0x3e   :  { %s4971_s8 = smov [#allocation8]  }
  0x3f   :  { %4579 = vmatpush3.bf16.msra.mxu1 %v4576_v6  ;;  %s4037_s1 = sshll.u32 %s4971_s8, 4  ;;  %s4038_s1 = int_to_ptr.vmem [resolvable:$true] %s4037_s1 }
  0x40   :  { %4285 = vmatprep.subr.mxu1 %v4957_v8  ;;  %s4922_s9 = scalar_lea.vmem %s4038_s1, 256  ;;  %p4927_p11 = scmp.lt.s32.totalorder %s4038_s1, %s4038_s1 }
  0x41   :  { %p4923_p10 = scmp.ne.s32.totalorder %s4038_s1, %s4922_s9  ;;  %p4928_p12 = scmp.lt.s32.totalorder %s4922_s9, %s4922_s9 }
  0x42   :  { %4283 = vmatmul.mubr.msk.f32.vlgmr.msra.gmra.mrb[0].mxu1 %vm75_vm0, %v5046_v7 }
  0x43   :  { %4287 = vmatprep.mubr.msk.f32.mxu1 %vm4958_vm1, %v4957_v8  ;;  %p4929_p13 = por %p4928_p12, %p4927_p11 }
  0x45   :  { %p4930_p0 = pnand %p4929_p13, %p4923_p10 }
 0x115   :  { %v4284_v10 = vpop.f32.mrb[0].mxu1 }
 0x116   :  { %v148_v11 = vpop.f32.mrb[1].mxu1  ;;  %v5060_v13 = vadd.f32 %v4284_v10, %v74_v9 }
 0x117   :  { %v5056_v12 = vadd.f32 %v148_v11, %v74_v9 }
 0x118   :  { %v5067_v14 = vmul.f32 0.35355338, %v5060_v13 }
 0x119   :  { %165 = vrot.lane.b32.xlu0 %v5056_v12, %s4959_s2  ;;  %v5074_v16 = vmul.f32 0.35355338, %v5056_v12 }
 0x11d   :  { %244 = vrot.lane.b32.xlu0 %v5060_v13, %s4959_s2 }
 0x121   :  { %419 = vrot.lane.b32.xlu0 %v5060_v13, %s4960_s23 }
 0x125   :  { %573 = vrot.lane.b32.xlu0 %v5067_v14, %s4961_s26 }
 0x18b   :  { %v166_v15 = vpop.permute.xlu0 %165 }
 0x18c   :  { %4286 = vmatpush3.xpose.msk.msra.mxu1 %vm167_vm2, %v166_v15 }
 0x18d   :  { %4290 = vmatprep.subr.mxu1 %v4957_v8 }
 0x18f   :  { %v245_v17 = vpop.permute.xlu0 %244  ;;  %4288 = vmatmul.mubr.msk.f32.vlgmr.msra.gmra.mrb[2].mxu1 %vm167_vm2, %v5074_v16 }
 0x190   :  { %4291 = vmatpush3.xpose.msk.msra.mxu1 %vm167_vm2, %v245_v17  ;;  %4292 = vmatprep.mubr.msk.f32.mxu1 %vm4958_vm1, %v4957_v8 }
 0x191   :  { %4300 = vmatprep.subr.mxu1 %v4957_v8 }
 0x193   :  { %v420_v18 = vpop.permute.xlu0 %419  ;;  %4293 = vmatmul.mubr.msk.f32.vlgmr.msra.gmra.mrb[4].mxu1 %vm167_vm2, %v5067_v14 }
 0x194   :  { %4301 = vmatpush3.msra.mxu1 %v420_v18  ;;  %4302 = vmatprep.mubr.msk.f32.mxu1 %vm4958_vm1, %v4957_v8 }
 0x195   :  { %4310 = vmatprep.subr.mxu1 %v4957_v8 }
 0x197   :  { %v574_v31 = vpop.permute.xlu0 %573 }
 0x262   :  { %v239_v23 = vpop.f32.mrb[2].mxu1 }
 0x263   :  { %v240_v24 = vadd.f32 %v239_v23, %v5091_v22  ;;  %v4289_v25 = vpop.f32.mrb[3].mxu1 }
 0x265   :  { %v321_v26 = vsel %vm167_vm2, %v240_v24, -inf }
 0x266   :  { %322 = vmax.xlane.f32.xlu0 %v321_v26  ;;  %v317_v27 = vpop.f32.mrb[4].mxu1 }
 0x267   :  { %v318_v28 = vadd.f32 %v317_v27, %v5091_v22  ;;  %v4294_v29 = vpop.f32.mrb[5].mxu1 }
 0x268   :  { %v160_v29 = vld [vmem:[#allocation7 + $0x40] sm:$0xff] }
 0x269   :  { %v324_v30 = vsel %vm167_vm2, %v318_v28, -inf }
 0x26a   :  { %325 = vmax.xlane.f32.xlu1 %v324_v30  ;;  %v159_v30 = vld [vmem:[#allocation7 + $0x8] sm:$0xff] }
 0x27c   :  { %343 = vrot.lane.b32.xlu0 %v5056_v12, %s4960_s23 }
 0x280   :  { %495 = vrot.lane.b32.xlu0 %v5074_v16, %s4961_s26 }
 0x2f3   :  { %v323_v32 = vpop.xlane.xlu0 %322 }
 0x2f4   :  { %v327_v39 = vsub.f32 %v240_v24, %v323_v32 }
 0x2f6   :  { %v329_v40 = vmul.f32 1.442695, %v327_v39 }
 0x2f7   :  { %v344_v33 = vpop.permute.xlu0 %343  ;;  %v326_v34 = vpop.xlane.xlu1 %325 }
 0x2f8   :  { %v328_v35 = vsub.f32 %v318_v28, %v326_v34  ;;  %4296 = vmatpush3.msra.mxu0 %v344_v33 }
 0x2f9   :  { %4305 = vmatprep.subr.mxu0 %v4957_v8 }
 0x2fa   :  { %v331_v36 = vmul.f32 1.442695, %v328_v35 }
 0x2fb   :  { %v496_v51 = vpop.permute.xlu0 %495 }
 0x2fc   :  { %4780 = vpow2.f32 %v331_v36 }
 0x2fd   :  { %4782 = vpow2.f32 %v329_v40 }
 0x306   :  { %v4781_v37 = vpop.eup %4780 }
 0x307   :  { %v336_v38 = vsel %vm167_vm2, %v4781_v37, 0.0  ;;  %v4783_v41 = vpop.eup %4782 }
 0x308   :  { %337 = vadd.xlane.f32.xlu1 %v336_v38  ;;  %v333_v42 = vsel %vm167_vm2, %v4783_v41, 0.0 }
 0x319   :  { %575 = vrot.lane.b32.xlu1 %v5060_v13, %s4962_s27 }
 0x33d   :  { %334 = vadd.xlane.f32.xlu1 %v333_v42 }
 0x34e   :  { %497 = vrot.lane.b32.xlu1 %v5056_v12, %s4962_s27 }
 0x352   :  { %989 = vrot.lane.b32.xlu1 %v5056_v12, %s4963_s28 }
 0x395   :  { %v338_v43 = vpop.xlane.xlu1 %337 }
 0x396   :  { %4784 = vrcp.f32 %v338_v43 }
 0x399   :  { %v576_v46 = vpop.permute.xlu1 %575 }
 0x3a0   :  { %v4785_v44 = vpop.eup %4784 }
 0x3a1   :  { %v342_v45 = vmul.f32 %v4785_v44, %v4781_v37 }
 0x3a3   :  { %4303 = vmatmul.mubr.msk.f32.vlgmr.msra.gmra.mrb[6].mxu1 %vm167_vm2, %v342_v45 }
 0x3a4   :  { %4311 = vmatpush3.xpose.msk.msra.mxu1 %vm167_vm2, %v576_v46  ;;  %4312 = vmatprep.mubr.msk.f32.mxu1 %vm4958_vm1, %v4957_v8 }
 0x3a5   :  { %4320 = vmatprep.subr.mxu1 %v4957_v8 }
 0x3a7   :  { %4313 = vmatmul.mubr.msk.f32.vlgmr.msra.gmra.mrb[8].mxu1 %vm167_vm2, %v574_v31 }
 0x3a8   :  { %4322 = vmatprep.mubr.msk.f32.mxu1 %vm4958_vm1, %v4957_v8 }
 0x3ca   :  { %v335_v47 = vpop.xlane.xlu1 %334 }
 0x3cb   :  { %4786 = vrcp.f32 %v335_v47 }
 0x3ce   :  { %v498_v50 = vpop.permute.xlu1 %497 }
 0x3d2   :  { %v990_v20 = vpop.permute.xlu1 %989 }
 0x3d5   :  { %v4787_v48 = vpop.eup %4786 }
 0x3d6   :  { %v341_v49 = vmul.f32 %v4787_v48, %v4783_v41 }
 0x3d8   :  { %4298 = vmatmul.mubr.msk.f32.vlgmr.msra.gmra.mrb[0].mxu0 %vm167_vm2, %v341_v49 }
 0x3d9   :  { %4306 = vmatpush3.xpose.msk.msra.mxu0 %vm167_vm2, %v498_v50  ;;  %4307 = vmatprep.mubr.msk.f32.mxu0 %vm4958_vm1, %v4957_v8 }
 0x3da   :  { %4315 = vmatprep.subr.mxu0 %v4957_v8 }
 0x3dc   :  { %4308 = vmatmul.mubr.msk.f32.vlgmr.msra.gmra.mrb[2].mxu0 %vm167_vm2, %v496_v51 }
 0x3dd   :  { %4317 = vmatprep.mubr.msk.f32.mxu0 %vm4958_vm1, %v4957_v8 }
 0x476   :  { %v5126_v52 = vpop.f32.mrb[6].mxu1 }
 0x477   :  { %v4304_v53 = vpop.f32.mrb[7].mxu1 }
 0x47a   :  { %v647_v54 = vpop.f32.mrb[8].mxu1 }
 0x47b   :  { %v648_v55 = vadd.f32 %v647_v54, %v5091_v22  ;;  %v4314_v56 = vpop.f32.mrb[9].mxu1 }
 0x47d   :  { %v654_v57 = vsel %vm167_vm2, %v648_v55, -inf }
 0x47e   :  { %655 = vmax.xlane.f32.xlu0 %v654_v57 }
 0x494   :  { %749 = vrot.lane.b32.xlu0 %v5060_v13, %s4956_s15 }
 0x498   :  { %987 = vrot.lane.b32.xlu0 %v5074_v16, %s4964_s29 }
 0x49c   :  { %1067 = vrot.lane.b32.xlu0 %v5060_v13, %s4963_s28 }
 0x4ab   :  { %v5136_v58 = vpop.f32.mrb[0].mxu0 }
 0x4ac   :  { %v4299_v59 = vpop.f32.mrb[1].mxu0 }
 0x4af   :  { %v569_v60 = vpop.f32.mrb[2].mxu0 }
 0x4b0   :  { %v4309_v61 = vpop.f32.mrb[3].mxu0  ;;  %v570_v62 = vadd.f32 %v569_v60, %v5091_v22 }
 0x4b2   :  { %v651_v63 = vsel %vm167_vm2, %v570_v62, -inf }
 0x4bb   :  { %652 = vmax.xlane.f32.xlu0 %v651_v63 }
 0x4d1   :  { %673 = vrot.lane.b32.xlu0 %v5056_v12, %s4956_s15 }
 0x4d5   :  { %1165 = vrot.lane.b32.xlu0 %v5056_v12, %s4965_s30 }
 0x4d9   :  { %1402 = vrot.lane.b32.xlu0 %v5056_v12, %s4966_s4 }
 0x4dd   :  { %1480 = vrot.lane.b32.xlu0 %v5060_v13, %s4966_s4 }
 0x4e1   :  { %1400 = vrot.lane.b32.xlu0 %v5074_v16, %s4967_s5 }
 0x4e5   :  { %1478 = vrot.lane.b32.xlu0 %v5067_v14, %s4967_s5 }
 0x50b   :  { %v656_v0 = vpop.xlane.xlu0 %655 }
 0x50c   :  { %v658_v1 = vsub.f32 %v648_v55, %v656_v0 }
 0x50e   :  { %v661_v2 = vmul.f32 1.442695, %v658_v1 }
 0x50f   :  { %v750_v3 = vpop.permute.xlu0 %749 }
 0x510   :  { %4788 = vpow2.f32 %v661_v2  ;;  %4321 = vmatpush3.msra.mxu1 %v750_v3 }
 0x511   :  { %4335 = vmatprep.subr.mxu1 %v4957_v8 }
 0x513   :  { %v988_v9 = vpop.permute.xlu0 %987 }
 0x517   :  { %v1068_v10 = vpop.permute.xlu0 %1067 }
 0x51a   :  { %v4789_v4 = vpop.eup %4788 }
 0x51b   :  { %v666_v6 = vsel %vm167_vm2, %v4789_v4, 0.0 }
 0x51c   :  { %667 = vadd.xlane.f32.xlu1 %v666_v6 }
 0x52d   :  { %1065 = vrot.lane.b32.xlu1 %v5067_v14, %s4964_s29 }
 0x548   :  { %v653_v11 = vpop.xlane.xlu0 %652 }
 0x549   :  { %v657_v15 = vsub.f32 %v570_v62, %v653_v11 }
 0x54b   :  { %v659_v16 = vmul.f32 1.442695, %v657_v15 }
 0x54c   :  { %v674_v17 = vpop.permute.xlu0 %673 }
 0x54d   :  { %4790 = vpow2.f32 %v659_v16  ;;  %4316 = vmatpush3.msra.mxu0 %v674_v17 }
 0x54e   :  { %4325 = vmatprep.subr.mxu0 %v160_v29 }
 0x550   :  { %v1166_v43 = vpop.permute.xlu0 %1165 }
 0x557   :  { %v4791_v18 = vpop.eup %4790 }
 0x558   :  { %v663_v19 = vsel %vm167_vm2, %v4791_v18, 0.0 }
 0x559   :  { %664 = vadd.xlane.f32.xlu1 %v663_v19 }
 0x5a9   :  { %v668_v23 = vpop.xlane.xlu1 %667 }
 0x5aa   :  { %4792 = vrcp.f32 %v668_v23 }
 0x5ad   :  { %v1066_v14 = vpop.permute.xlu1 %1065 }
 0x5b4   :  { %v4793_v24 = vpop.eup %4792 }
 0x5b5   :  { %v672_v25 = vmul.f32 %v4793_v24, %v4789_v4 }
 0x5b7   :  { %4323 = vmatmul.mubr.msk.f32.vlgmr.msra.gmra.mrb[10].mxu1 %vm167_vm2, %v672_v25 }
 0x5b8   :  { %4336 = vmatpush3.xpose.msk.msra.mxu1 %vm167_vm2, %v990_v20  ;;  %4337 = vmatprep.mubr.msk.f32.mxu1 %vm4958_vm1, %v4957_v8 }
 0x5b9   :  { %4340 = vmatprep.subr.mxu1 %v4957_v8 }
 0x5bb   :  { %4338 = vmatmul.mubr.msk.f32.vlgmr.msra.gmra.mrb[12].mxu1 %vm167_vm2, %v988_v9 }
 0x5bc   :  { %4341 = vmatpush3.xpose.msk.msra.mxu1 %vm167_vm2, %v1068_v10  ;;  %4342 = vmatprep.mubr.msk.f32.mxu1 %vm4958_vm1, %v4957_v8 }
 0x5bd   :  { %4350 = vmatprep.subr.mxu1 %v4957_v8 }
 0x5bf   :  { %4343 = vmatmul.mubr.msk.f32.vlgmr.msra.gmra.mrb[14].mxu1 %vm167_vm2, %v1066_v14 }
 0x5c0   :  { %4352 = vmatprep.mubr.msk.f32.mxu1 %vm4958_vm1, %v4957_v8 }
 0x5e6   :  { %v665_v26 = vpop.xlane.xlu1 %664 }
 0x5e7   :  { %4794 = vrcp.f32 %v665_v26 }
 0x5f1   :  { %v4795_v27 = vpop.eup %4794 }
 0x5f2   :  { %v671_v28 = vmul.f32 %v4795_v27, %v4791_v18 }
 0x5f4   :  { %4318 = vmatmul.mubr.msk.f32.vlgmr.msra.gmra.mrb[4].mxu0 %vm167_vm2, %v671_v28 }
 0x5f5   :  { %4326 = vmatpush3.msra.mxu0 %v160_v29 }
 0x5f6   :  { %4330 = vmatprep.subr.mxu0 %v159_v30 }
 0x68a   :  { %v821_v31 = vpop.f32.mrb[10].mxu1 }
 0x68b   :  { %v4324_v32 = vpop.f32.mrb[11].mxu1 }
 0x68e   :  { %v1061_v33 = vpop.f32.mrb[12].mxu1 }
 0x68f   :  { %v1062_v34 = vadd.f32 %v1061_v33, %v5091_v22  ;;  %v4339_v35 = vpop.f32.mrb[13].mxu1 }
 0x691   :  { %v1143_v36 = vsel %vm167_vm2, %v1062_v34, -inf }
 0x692   :  { %1144 = vmax.xlane.f32.xlu1 %v1143_v36  ;;  %v1139_v37 = vpop.f32.mrb[14].mxu1 }
 0x693   :  { %v1140_v38 = vadd.f32 %v1139_v37, %v5091_v22  ;;  %v4344_v39 = vpop.f32.mrb[15].mxu1 }
 0x695   :  { %v1146_v40 = vsel %vm167_vm2, %v1140_v38, -inf }
 0x696   :  { %1147 = vmax.xlane.f32.xlu1 %v1146_v40 }
 0x6c7   :  { %v745_v41 = vpop.f32.mrb[4].mxu0 }
 0x6c8   :  { %v4319_v42 = vpop.f32.mrb[5].mxu0  ;;  %4327 = vmatprep.mubr.msk.f32.mxu0 %vm167_vm2, %v745_v41 }
 0x6c9   :  { %4328 = vmatmul.mubr.msk.f32.vlgmr.msra.gmra.mrb[6].mxu0 %vm167_vm2, %v821_v31 }
 0x6ca   :  { %4332 = vmatprep.mubr.msk.f32.mxu0 %vm167_vm2, %v5136_v58  ;;  %4331 = vmatpush3.msra.mxu0 %v159_v30  ;;  %v1403_v58 = vpop.permute.xlu0 %1402 }
 0x6cb   :  { %4345 = vmatprep.subr.mxu0 %v4957_v8 }
 0x6ce   :  { %v1481_v62 = vpop.permute.xlu0 %1480 }
 0x6d1   :  { %4333 = vmatmul.mubr.msk.f32.vlgmr.msra.gmra.mrb[6].mxu0 %vm167_vm2, %v5126_v52  ;;  %v161_v52 = vld [vmem:[#allocation7 + $0x78] sm:$0xff] }
 0x6d2   :  { %4346 = vmatpush3.msra.mxu0 %v1166_v43  ;;  %4347 = vmatprep.mubr.msk.f32.mxu0 %vm4958_vm1, %v4957_v8  ;;  %v1401_v0 = vpop.permute.xlu0 %1400 }
 0x6d3   :  { %4355 = vmatprep.subr.mxu0 %v161_v52 }
 0x6d6   :  { %v1479_v6 = vpop.permute.xlu0 %1478 }
 0x71f   :  { %v1145_v44 = vpop.xlane.xlu1 %1144 }
 0x720   :  { %v1149_v45 = vsub.f32 %v1062_v34, %v1145_v44 }
 0x722   :  { %v1151_v46 = vmul.f32 1.442695, %v1149_v45 }
 0x723   :  { %v1148_v47 = vpop.xlane.xlu1 %1147 }
 0x724   :  { %4796 = vpow2.f32 %v1151_v46  ;;  %v1150_v48 = vsub.f32 %v1140_v38, %v1148_v47 }
 0x726   :  { %v1153_v49 = vmul.f32 1.442695, %v1150_v48 }
 0x728   :  { %4798 = vpow2.f32 %v1153_v49 }
 0x72e   :  { %v4797_v50 = vpop.eup %4796 }
 0x72f   :  { %v1155_v51 = vsel %vm167_vm2, %v4797_v50, 0.0 }
 0x730   :  { %1156 = vadd.xlane.f32.xlu1 %v1155_v51 }
 0x732   :  { %v4799_v53 = vpop.eup %4798 }
 0x733   :  { %v1158_v54 = vsel %vm167_vm2, %v4799_v53, 0.0 }
 0x734   :  { %1159 = vadd.xlane.f32.xlu1 %v1158_v54 }
 0x745   :  { %1241 = vrot.lane.b32.xlu1 %v5060_v13, %s4965_s30 }
 0x7bd   :  { %v1157_v55 = vpop.xlane.xlu1 %1156 }
 0x7be   :  { %4800 = vrcp.f32 %v1157_v55 }
 0x7c1   :  { %v1160_v56 = vpop.xlane.xlu1 %1159 }
 0x7c2   :  { %4802 = vrcp.f32 %v1160_v56 }
 0x7c5   :  { %v1242_v57 = vpop.permute.xlu1 %1241 }
 0x7c6   :  { %4351 = vmatpush3.msra.mxu1 %v1242_v57 }
 0x7c7   :  { %4360 = vmatprep.subr.mxu1 %v4957_v8 }
 0x7c8   :  { %v4801_v59 = vpop.eup %4800 }
 0x7c9   :  { %v1163_v60 = vmul.f32 %v4801_v59, %v4797_v50  ;;  %v1939_v59 = vld [vmem:[#allocation7 + $0x50] sm:$0xff] }
 0x7cb   :  { %4348 = vmatmul.mubr.msk.f32.vlgmr.msra.gmra.mrb[8].mxu0 %vm167_vm2, %v1163_v60 }
 0x7cc   :  { %v4803_v61 = vpop.eup %4802  ;;  %4356 = vmatpush3.msra.mxu0 %v161_v52 }
 0x7cd   :  { %v1164_v63 = vmul.f32 %v4803_v61, %v4799_v53  ;;  %4365 = vmatprep.subr.mxu0 %v4957_v8  ;;  %v1940_v61 = vld [vmem:[#allocation7 + $0x88] sm:$0xff] }
 0x7cf   :  { %4353 = vmatmul.mubr.msk.f32.vlgmr.msra.gmra.mrb[16].mxu1 %vm167_vm2, %v1164_v63 }
 0x7d0   :  { %4361 = vmatpush3.xpose.msk.msra.mxu1 %vm167_vm2, %v1403_v58  ;;  %4362 = vmatprep.mubr.msk.f32.mxu1 %vm4958_vm1, %v4957_v8 }
 0x7d1   :  { %4370 = vmatprep.subr.mxu1 %v4957_v8 }
 0x7d3   :  { %4363 = vmatmul.mubr.msk.f32.vlgmr.msra.gmra.mrb[18].mxu1 %vm167_vm2, %v1401_v0  ;;  %v58_v0 = vld [vmem:[#allocation5] sm:$0xff] }
 0x7d4   :  { %4372 = vmatprep.mubr.msk.f32.mxu1 %vm4958_vm1, %v4957_v8 }
 0x89e   :  { %v1237_v1 = vpop.f32.mrb[8].mxu0 }
 0x89f   :  { %v4349_v2 = vpop.f32.mrb[9].mxu0  ;;  %4357 = vmatprep.mubr.msk.f32.mxu0 %vm167_vm2, %v1237_v1  ;;  %v59_v1 = vld [vmem:[#allocation5 + $0x8] sm:$0xff] }
 0x8a0   :  { %v1850_v2 = vld [vmem:[#allocation7 + $0x10] sm:$0xff] }
 0x8a2   :  { %v1313_v3 = vpop.f32.mrb[16].mxu1 }
 0x8a3   :  { %v4354_v4 = vpop.f32.mrb[17].mxu1  ;;  %4358 = vmatmul.mubr.msk.f32.vlgmr.msra.gmra.mrb[6].mxu0 %vm167_vm2, %v1313_v3  ;;  %v1851_v3 = vld [vmem:[#allocation7 + $0x48] sm:$0xff] }
 0x8a4   :  { %4366 = vmatpush3.xpose.msk.msra.mxu0 %vm167_vm2, %v1481_v62  ;;  %4367 = vmatprep.mubr.msk.f32.mxu0 %vm4958_vm1, %v4957_v8  ;;  %v1941_v62 = vld [vmem:[#allocation7 + $0xc0] sm:$0xff]  ;;  %v60_v4 = vld [vmem:[#allocation5 + $0x10] sm:$0xff] }
 0x8a5   :  { %4375 = vmatprep.subr.mxu0 %v4957_v8  ;;  %v4592_v63 = vpack.c.bf16 %v1941_v62, %v1940_v61 }
 0x8a6   :  { %v1474_v9 = vpop.f32.mrb[18].mxu1 }
 0x8a7   :  { %v1475_v10 = vadd.f32 %v1474_v9, %v5091_v22  ;;  %v4364_v11 = vpop.f32.mrb[19].mxu1  ;;  %4368 = vmatmul.mubr.msk.f32.vlgmr.msra.gmra.mrb[10].mxu0 %vm167_vm2, %v1479_v6  ;;  %v4580_v6 = vpack.c.bf16 %v1851_v3, %v1850_v2  ;;  %v61_v9 = vld [vmem:[#allocation5 + $0x18] sm:$0xff] }
 0x8a8   :  { %4377 = vmatprep.mubr.msk.f32.mxu0 %vm4958_vm1, %v4957_v8  ;;  %v1853_v11 = vld [vmem:[#allocation7 + $0xb8] sm:$0xff] }
 0x8a9   :  { %v1556_v15 = vsel %vm167_vm2, %v1475_v10, -inf }
 0x8aa   :  { %1557 = vmax.xlane.f32.xlu1 %v1556_v15 }
 0x937   :  { %v1558_v16 = vpop.xlane.xlu1 %1557 }
 0x938   :  { %v1562_v17 = vsub.f32 %v1475_v10, %v1558_v16  ;;  %v1852_v10 = vld [vmem:[#allocation7 + $0x80] sm:$0xff]  ;;  %v4969_v16 = vmov 0.0|0.0  }
 0x939   :  { %v4584_v15 = vpack.c.bf16 %v1853_v11, %v1852_v10 }
 0x93a   :  { %v1564_v18 = vmul.f32 1.442695, %v1562_v17 }
 0x93c   :  { %4804 = vpow2.f32 %v1564_v18 }
 0x946   :  { %v4805_v25 = vpop.eup %4804 }
 0x947   :  { %v1568_v14 = vsel %vm167_vm2, %v4805_v25, 0.0 }
 0x97a   :  { %v1552_v19 = vpop.f32.mrb[10].mxu0 }
 0x97b   :  { %v1553_v20 = vadd.f32 %v1552_v19, %v5091_v22  ;;  %v4369_v23 = vpop.f32.mrb[11].mxu0 }
 0x97d   :  { %v1559_v24 = vsel %vm167_vm2, %v1553_v20, -inf }
 0x97e   :  { %1560 = vmax.xlane.f32.xlu0 %v1559_v24 }
 0x982   :  { %1569 = vadd.xlane.f32.xlu0 %v1568_v14  ;;  %v1817_v14 = vld [vmem:[#allocation7 + $0x1f8] ss:$0 sm:$0xff] }
 0x998   :  { %1578 = vrot.lane.b32.xlu0 %v5056_v12, %s4968_s6  ;;  %v162_v12 = vld [vmem:[#allocation7 + $0xb0] sm:$0xff] }
 0xa0b   :  { %v1561_v26 = vpop.xlane.xlu0 %1560 }
 0xa0c   :  { %v1563_v27 = vsub.f32 %v1553_v20, %v1561_v26 }
 0xa0e   :  { %v1566_v28 = vmul.f32 1.442695, %v1563_v27 }
 0xa0f   :  { %v1570_v29 = vpop.xlane.xlu0 %1569 }
 0xa10   :  { %4806 = vpow2.f32 %v1566_v28 }
 0xa11   :  { %4808 = vrcp.f32 %v1570_v29  ;;  %v1818_v29 = vld [vmem:[#allocation7 + $0x200] ss:$0 sm:$0xff] }
 0xa13   :  { %v1579_v30 = vpop.permute.xlu0 %1578 }
 0xa14   :  { %4371 = vmatpush3.msra.mxu1 %v1579_v30 }
 0xa15   :  { %4581 = vmatprep.subr.bf16.mxu1 %v4580_v6 }
 0xa1a   :  { %v4807_v22 = vpop.eup %4806 }
 0xa1b   :  { %v4809_v31 = vpop.eup %4808  ;;  %v1571_v32 = vsel %vm167_vm2, %v4807_v22, 0.0 }
 0xa1c   :  { %v1576_v33 = vmul.f32 %v4809_v31, %v4805_v25  ;;  %1572 = vadd.xlane.f32.xlu1 %v1571_v32 }
 0xa1e   :  { %4373 = vmatmul.mubr.msk.f32.vlgmr.msra.gmra.mrb[20].mxu1 %vm167_vm2, %v1576_v33  ;;  %v1942_v33 = vld [vmem:[#allocation7 + $0x1d8] ss:$0 sm:$0xff] }
 0xa1f   :  { %4583 = vmatpush3.bf16.msra.mxu1 %v4580_v6 }
 0xa20   :  { %4585 = vmatprep.subr.bf16.mxu1 %v4584_v15 }
 0xa23   :  { %4587 = vmatpush3.bf16.msra.mxu1 %v4584_v15 }
 0xa24   :  { %4596 = vmatprep.subr.bf16.mxu1 %v4969_v16 }
 0xa2d   :  { %1654 = vrot.lane.b32.xlu1 %v5060_v13, %s4968_s6  ;;  %v163_v13 = vld [vmem:[#allocation7 + $0x1c8] ss:$0 sm:$0xff] }
 0xaa9   :  { %v1573_v34 = vpop.xlane.xlu1 %1572 }
 0xaaa   :  { %4810 = vrcp.f32 %v1573_v34 }
 0xaad   :  { %v1655_v35 = vpop.permute.xlu1 %1654 }
 0xaae   :  { %4376 = vmatpush3.msra.mxu0 %v1655_v35 }
 0xaaf   :  { %4380 = vmatprep.subr.mxu0 %v162_v12 }
 0xab4   :  { %v4811_v36 = vpop.eup %4810 }
 0xab5   :  { %v1577_v37 = vmul.f32 %v4811_v36, %v4807_v22 }
 0xab7   :  { %4378 = vmatmul.mubr.msk.f32.vlgmr.msra.gmra.mrb[12].mxu0 %vm167_vm2, %v1577_v37 }
 0xab8   :  { %4381 = vmatpush3.msra.mxu0 %v162_v12 }
 0xaf1   :  { %v1650_v38 = vpop.f32.mrb[20].mxu1 }
 0xaf2   :  { %v4374_v39 = vpop.f32.mrb[21].mxu1  ;;  %4382 = vmatprep.mubr.msk.f32.mxu0 %vm167_vm2, %v1650_v38 }
 0xb8a   :  { %v1726_v40 = vpop.f32.mrb[12].mxu0 }
 0xb8b   :  { %v4379_v41 = vpop.f32.mrb[13].mxu0  ;;  %4383 = vmatmul.mubr.msk.f32.vlgmr.msra.gmra.mrb[6].mxu0 %vm167_vm2, %v1726_v40 }
 0xb8c   :  { %4404 = vmatprep.mubr.msk.f32.mxu0 %vm75_vm0, %v58_v0 }
 0xc5e   :  { %v4384_v42 = vpop.f32.mrb[6].mxu0 }
 0xc5f   :  { %v1814_v43 = vadd.f32 %v4384_v42, %v163_v13  ;;  %v1802_v44 = vpop.f32.mrb[7].mxu0 }
 0xc60   :  { %v1813_v45 = vadd.f32 %v1802_v44, %v163_v13 }
 0xc61   :  { %v1816_v46 = vadd.f32 %v1814_v43, %v5046_v7 }
 0xc62   :  { %v1815_v47 = vadd.f32 %v1813_v45, %v5042_v5  ;;  %v1938_v5 = vld [vmem:[#allocation7 + $0x18] sm:$0xff]  ;;  %v1854_v45 = vld [vmem:[#allocation7 + $0x1d0] ss:$0 sm:$0xff] }
 0xc63   :  { %v1822_v48 = vsel %vm75_vm0, %v1816_v46, 0.0  ;;  %v4588_v60 = vpack.c.bf16 %v1939_v59, %v1938_v5 }
 0xc64   :  { %1823 = vadd.xlane.f32.xlu0 %v1822_v48  ;;  %v1819_v49 = vsel %vm75_vm0, %v1815_v47, 0.0 }
 0xc65   :  { %1820 = vadd.xlane.f32.xlu1 %v1819_v49  ;;  %4589 = vmatprep.subr.bf16.mxu0 %v4588_v60 }
 0xc66   :  { %4591 = vmatpush3.bf16.msra.mxu0 %v4588_v60 }
 0xc67   :  { %4593 = vmatprep.subr.bf16.mxu0 %v4592_v63 }
 0xc6a   :  { %4595 = vmatpush3.bf16.msra.mxu0 %v4592_v63 }
 0xc6b   :  { %4600 = vmatprep.subr.bf16.mxu0 %v4969_v16 }
 0xc6d   :  { %4405 = vmatmul.mubr.msk.f32.vlgmr.msra.gmra.mrb[14].mxu0 %vm75_vm0, %v59_v1 }
 0xc6e   :  { %4407 = vmatprep.mubr.msk.f32.mxu0 %vm75_vm0, %v60_v4 }
 0xc71   :  { %4408 = vmatmul.mubr.msk.f32.gmra.mrb[16].mxu0 %vm75_vm0, %v61_v9 }
 0xc72   :  { %4421 = vmatprep.mubr.msk.f32.mxu0 %vm4958_vm1, %v4957_v8 }
 0xcf1   :  { %v1824_v50 = vpop.xlane.xlu0 %1823 }
 0xcf2   :  { %v1827_v51 = vmul.f32 0.03125, %v1824_v50  ;;  %v1821_v53 = vpop.xlane.xlu1 %1820 }
 0xcf3   :  { %v1826_v54 = vmul.f32 0.03125, %v1821_v53  ;;  %v5274_v53 = vsel %vm68_vm5, -1e+30, %v4957_v8 }
 0xcf4   :  { %v1829_v52 = vsub.f32 %v1816_v46, %v1827_v51 }
 0xcf5   :  { %v1828_v55 = vsub.f32 %v1815_v47, %v1826_v54 }
 0xcf6   :  { %v1831_v56 = vmul.f32 %v1829_v52, %v1829_v52 }
 0xcf7   :  { %v1830_v57 = vmul.f32 %v1828_v55, %v1828_v55 }
 0xcf8   :  { %v1835_v58 = vsel %vm75_vm0, %v1831_v56, 0.0 }
 0xcf9   :  { %1836 = vadd.xlane.f32.xlu1 %v1835_v58  ;;  %v1832_v7 = vsel %vm75_vm0, %v1830_v57, 0.0 }
 0xcfa   :  { %1833 = vadd.xlane.f32.xlu0 %v1832_v7 }
 0xd40   :  { %v4406_v34 = vpop.f32.mrb[14].mxu0 }
 0xd41   :  { %v2027_v12 = vadd.f32 %v4406_v34, %v1942_v33  ;;  %v2021_v35 = vpop.f32.mrb[15].mxu0 }
 0xd42   :  { %v2022_v36 = vadd.f32 %v2021_v35, %v1942_v33 }
 0xd44   :  { %v4409_v38 = vpop.f32.mrb[16].mxu0  ;;  %v4597_v39 = vpack.c.bf16 %v2027_v12, %v2022_v36  ;;  %v5253_v43 = vpack.i.bf16 %v2027_v12, %v2022_v36 }
 0xd45   :  { %v2037_v40 = vadd.f32 %v4409_v38, %v1942_v33  ;;  %v2031_v41 = vpop.f32.mrb[17].mxu0 }
 0xd46   :  { %v2032_v13 = vadd.f32 %v2031_v41, %v1942_v33 }
 0xd48   :  { %v4601_v42 = vpack.c.bf16 %v2037_v40, %v2032_v13  ;;  %v5258_v44 = vpack.i.bf16 %v2037_v40, %v2032_v13 }
 0xd4a   :  { %4603 = vmatpush3.bf16.xpose.msk.msra.mxu0 %vm5246_vm4, %v4601_v42 }
 0xd4b   :  { %4610 = vmatprep.subr.bf16.mxu0 %v4969_v16 }
 0xd86   :  { %v1837_v17 = vpop.xlane.xlu1 %1836 }
 0xd87   :  { %v1839_v18 = vmul.f32 0.03125, %v1837_v17  ;;  %v1834_v19 = vpop.xlane.xlu0 %1833 }
 0xd88   :  { %v1838_v20 = vmul.f32 0.03125, %v1834_v19 }
 0xd89   :  { %v1841_v23 = vadd.f32 1e-05, %v1839_v18 }
 0xd8a   :  { %v1840_v24 = vadd.f32 1e-05, %v1838_v20 }
 0xd8b   :  { %4812 = vrsqrt.f32 %v1841_v23 }
 0xd8c   :  { %4814 = vrsqrt.f32 %v1840_v24 }
 0xd95   :  { %v4813_v25 = vpop.eup %4812 }
 0xd96   :  { %v4815_v26 = vpop.eup %4814  ;;  %v1845_v27 = vmul.f32 %v4813_v25, %v1829_v52 }
 0xd97   :  { %v1844_v28 = vmul.f32 %v4815_v26, %v1828_v55 }
 0xd98   :  { %v1847_v30 = vmul.f32 %v1845_v27, %v1817_v14 }
 0xd99   :  { %v1846_v22 = vmul.f32 %v1844_v28, %v1817_v14 }
 0xd9a   :  { %v5236_v32 = vadd.f32 %v1847_v30, %v1818_v29 }
 0xd9b   :  { %v5234_v31 = vadd.f32 %v1846_v22, %v1818_v29 }
 0xd9d   :  { %4393 = vmatprep.mubr.msk.f32.mxu1 %vm75_vm0, %v5234_v31 }
 0xd9e   :  { %4394 = vmatmul.mubr.msk.f32.vlgmr.msra.gmra.mrb[22].mxu1 %vm75_vm0, %v5236_v32 }
 0xd9f   :  { %4414 = vmatprep.mubr.msk.f32.mxu1 %vm4958_vm1, %v4957_v8  ;;  %4599 = vmatpush3.bf16.xpose.msk.msra.mxu1 %vm5246_vm4, %v4597_v39 }
 0xda0   :  { %4604 = vmatprep.subr.bf16.mxu1 %v4969_v16 }
 0xe71   :  { %v4395_v46 = vpop.f32.mrb[22].mxu1 }
 0xe72   :  { %v1933_v47 = vadd.f32 %v4395_v46, %v1854_v45  ;;  %v1927_v48 = vpop.f32.mrb[23].mxu1 }
 0xe73   :  { %v1928_v49 = vadd.f32 %v1927_v48, %v1854_v45 }
 0xe74   :  { %v5260_v50 = vmul.f32 0.35355338, %v1933_v47 }
 0xe75   :  { %v5262_v51 = vmul.f32 0.35355338, %v1928_v49 }
 0xe76   :  { %4422 = vmatmul.mubr.msk.f32.vlgmr.msra.gmra.mrb[18].mxu0 %vm167_vm2, %v5260_v50 }
 0xe77   :  { %4415 = vmatmul.mubr.msk.f32.vlgmr.msra.gmra.mrb[24].mxu1 %vm167_vm2, %v5262_v51  ;;  %4442 = vmatprep.mubr.msk.f32.mxu0 %vm4958_vm1, %v4957_v8 }
 0xe78   :  { %4428 = vmatprep.mubr.msk.f32.mxu1 %vm4958_vm1, %v4957_v8 }
 0xf49   :  { %v2199_v54 = vpop.f32.mrb[18].mxu0 }
 0xf4a   :  { %v2200_v52 = vadd.f32 %v2199_v54, %v5274_v53  ;;  %v2120_v55 = vpop.f32.mrb[24].mxu1  ;;  %v4423_v56 = vpop.f32.mrb[19].mxu0 }
 0xf4b   :  { %v2121_v57 = vadd.f32 %v2120_v55, %v5274_v53  ;;  %v4416_v58 = vpop.f32.mrb[25].mxu1 }
 0xf4c   :  { %v2207_v7 = vsel %vm2203_vm6, %v2200_v52, -inf }
 0xf4d   :  { %2208 = vmax.xlane.f32.xlu1 %v2207_v7  ;;  %v2204_v5 = vsel %vm2203_vm6, %v2121_v57, -inf }
 0xf4e   :  { %2205 = vmax.xlane.f32.xlu0 %v2204_v5 }
 0xfda   :  { %v2209_v59 = vpop.xlane.xlu1 %2208 }
 0xfdb   :  { %v2211_v21 = vsub.f32 %v2200_v52, %v2209_v59  ;;  %v2206_v60 = vpop.xlane.xlu0 %2205 }
 0xfdc   :  { %v2210_v61 = vsub.f32 %v2121_v57, %v2206_v60 }
 0xfdd   :  { %v2214_v62 = vmul.f32 1.442695, %v2211_v21 }
 0xfde   :  { %v2212_v63 = vmul.f32 1.442695, %v2210_v61 }
 0xfdf   :  { %4816 = vpow2.f32 %v2214_v62 }
 0xfe0   :  { %4818 = vpow2.f32 %v2212_v63 }
 0xfe9   :  { %v4817_v0 = vpop.eup %4816 }
 0xfea   :  { %v4819_v1 = vpop.eup %4818  ;;  %v2219_v2 = vsel %vm2203_vm6, %v4817_v0, 0.0 }
 0xfeb   :  { %2220 = vadd.xlane.f32.xlu1 %v2219_v2  ;;  %v2216_v3 = vsel %vm2203_vm6, %v4819_v1, 0.0 }
 0xfec   :  { %2217 = vadd.xlane.f32.xlu0 %v2216_v3 }
 0xffc   :  { %4716 = vrot.lane.b32.xlu1 %v5258_v44, %s4959_s2 }
0x1000   :  { %4721 = vrot.lane.b32.xlu1 %v5253_v43, %s4961_s26 }
0x1002   :  { %4711 = vrot.lane.b32.xlu0 %v5253_v43, %s4959_s2 }
0x1004   :  { %2384 = vrot.lane.b32.xlu1 %v5262_v51, %s4961_s26 }
0x1006   :  { %4726 = vrot.lane.b32.xlu0 %v5258_v44, %s4961_s26 }
0x100a   :  { %2466 = vrot.lane.b32.xlu0 %v5260_v50, %s4961_s26 }
0x1078   :  { %v2221_v4 = vpop.xlane.xlu1 %2220 }
0x1079   :  { %v2218_v6 = vpop.xlane.xlu0 %2217 }
0x107a   :  { %4820 = vrcp.f32 %v2218_v6 }
0x107b   :  { %4822 = vrcp.f32 %v2221_v4 }
0x107c   :  { %v4717_v9 = vpop.permute.xlu1 %4716 }
0x107d   :  { %v4712_v10 = vpop.permute.xlu0 %4711  ;;  %v4719_v23 = vunpack.i.h.bf16 %v4717_v9  ;;  %v4718_v24 = vunpack.i.l.bf16 %v4717_v9 }
0x107e   :  { %v4714_v11 = vunpack.i.h.bf16 %v4712_v10  ;;  %v4713_v15 = vunpack.i.l.bf16 %v4712_v10 }
0x107f   :  { %v4608_v28 = vpack.c.bf16 %v4719_v23, %v4718_v24  ;;  %v2041_v24 = vld [vmem:[#allocation7 + $0x58] sm:$0xff] }
0x1080   :  { %v4605_v17 = vpack.c.bf16 %v4714_v11, %v4713_v15  ;;  %v4722_v18 = vpop.permute.xlu1 %4721 }
0x1081   :  { %v4724_v19 = vunpack.i.h.bf16 %v4722_v18  ;;  %v4723_v20 = vunpack.i.l.bf16 %v4722_v18  ;;  %v4727_v29 = vpop.permute.xlu0 %4726 }
0x1082   :  { %4606 = vmatpush3.bf16.msra.mxu1 %v4605_v17  ;;  %v4729_v22 = vunpack.i.h.bf16 %v4727_v29  ;;  %v4728_v33 = vunpack.i.l.bf16 %v4727_v29 }
0x1083   :  { %v4611_v25 = vpack.c.bf16 %v4724_v19, %v4723_v20  ;;  %4607 = vmatprep.subr.bf16.mxu1 %v4969_v16 }
0x1084   :  { %v4821_v14 = vpop.eup %4820  ;;  %v2385_v34 = vpop.permute.xlu1 %2384  ;;  %v4615_v12 = vpack.c.bf16 %v4729_v22, %v4728_v33 }
0x1085   :  { %v5295_v26 = vmul.f32 %v4821_v14, %v4819_v1  ;;  %4613 = vmatpush3.bf16.xpose.msk.msra.mxu0 %vm5246_vm4, %v4611_v25  ;;  %v4823_v27 = vpop.eup %4822  ;;  %v2467_v35 = vpop.permute.xlu0 %2466  ;;  %v2040_v25 = vld [vmem:[#allocation7 + $0x20] sm:$0xff] }
0x1086   :  { %4618 = vmatprep.subr.bf16.mxu0 %v4969_v16  ;;  %v5304_v30 = vmul.f32 %v4823_v27, %v4817_v0 }
0x1087   :  { %4429 = vmatmul.mubr.msk.f32.vlgmr.msra.gmra.mrb[26].mxu1 %vm2203_vm6, %v5295_v26 }
0x1088   :  { %4609 = vmatpush3.bf16.msra.mxu1 %v4608_v28  ;;  %4435 = vmatprep.mubr.msk.f32.mxu1 %vm4958_vm1, %v4957_v8 }
0x1089   :  { %4614 = vmatprep.subr.bf16.mxu1 %v4969_v16 }
0x108b   :  { %4436 = vmatmul.mubr.msk.f32.vlgmr.msra.gmra.mrb[28].mxu1 %vm2203_vm6, %v5304_v30 }
0x108c   :  { %4443 = vmatmul.mubr.msk.f32.vlgmr.msra.gmra.mrb[20].mxu0 %vm167_vm2, %v2385_v34  ;;  %4449 = vmatprep.mubr.msk.f32.mxu1 %vm4958_vm1, %v4957_v8 }
0x108d   :  { %4456 = vmatprep.mubr.msk.f32.mxu0 %vm4958_vm1, %v4957_v8 }
0x1091   :  { %4617 = vmatpush3.bf16.xpose.msk.msra.mxu1 %vm5246_vm4, %v4615_v12 }
0x1092   :  { %4621 = vmatprep.subr.bf16.mxu1 %v4969_v16 }
0x1098   :  { %4450 = vmatmul.mubr.msk.f32.vlgmr.msra.gmra.mrb[30].mxu1 %vm167_vm2, %v2467_v35 }
0x1099   :  { %4463 = vmatprep.mubr.msk.f32.mxu1 %vm4958_vm1, %v4957_v8 }
0x115a   :  { %v5320_v36 = vpop.f32.mrb[26].mxu1 }
0x115b   :  { %v4430_v38 = vpop.f32.mrb[27].mxu1 }
0x115e   :  { %v5322_v39 = vpop.f32.mrb[28].mxu1 }
0x115f   :  { %v4437_v40 = vpop.f32.mrb[29].mxu1  ;;  %v2462_v41 = vpop.f32.mrb[20].mxu0 }
0x1160   :  { %v2463_v13 = vadd.f32 %v2462_v41, %v5274_v53  ;;  %v4444_v42 = vpop.f32.mrb[21].mxu0 }
0x1162   :  { %v2548_v45 = vsel %vm2203_vm6, %v2463_v13, -inf }
0x1163   :  { %2549 = vmax.xlane.f32.xlu1 %v2548_v45 }
0x116b   :  { %v2544_v46 = vpop.f32.mrb[30].mxu1 }
0x116c   :  { %v2545_v47 = vadd.f32 %v2544_v46, %v5274_v53  ;;  %v4451_v48 = vpop.f32.mrb[31].mxu1 }
0x116e   :  { %v2551_v49 = vsel %vm2203_vm6, %v2545_v47, -inf }
0x116f   :  { %2552 = vmax.xlane.f32.xlu0 %v2551_v49 }
0x11f0   :  { %v2550_v54 = vpop.xlane.xlu1 %2549 }
0x11f1   :  { %v2554_v52 = vsub.f32 %v2463_v13, %v2550_v54 }
0x11f3   :  { %v2556_v55 = vmul.f32 1.442695, %v2554_v52 }
0x11f5   :  { %4824 = vpow2.f32 %v2556_v55 }
0x11fc   :  { %v2553_v56 = vpop.xlane.xlu0 %2552 }
0x11fd   :  { %v2555_v57 = vsub.f32 %v2545_v47, %v2553_v56 }
0x11ff   :  { %v4825_v58 = vpop.eup %4824  ;;  %v2558_v7 = vmul.f32 1.442695, %v2555_v57 }
0x1200   :  { %v2560_v5 = vsel %vm2203_vm6, %v4825_v58, 0.0 }
0x1201   :  { %4826 = vpow2.f32 %v2558_v7  ;;  %2561 = vadd.xlane.f32.xlu0 %v2560_v5 }
0x120b   :  { %v4827_v59 = vpop.eup %4826 }
0x120c   :  { %v2563_v21 = vsel %vm2203_vm6, %v4827_v59, 0.0 }
0x120d   :  { %2564 = vadd.xlane.f32.xlu1 %v2563_v21 }
0x1217   :  { %4731 = vrot.lane.b32.xlu0 %v5253_v43, %s4962_s27 }
0x121b   :  { %4746 = vrot.lane.b32.xlu0 %v5258_v44, %s4964_s29 }
0x121e   :  { %4736 = vrot.lane.b32.xlu1 %v5258_v44, %s4962_s27 }
0x121f   :  { %2972 = vrot.lane.b32.xlu0 %v5260_v50, %s4964_s29 }
0x1222   :  { %4741 = vrot.lane.b32.xlu1 %v5253_v43, %s4964_s29 }
0x1226   :  { %2890 = vrot.lane.b32.xlu1 %v5262_v51, %s4964_s29 }
0x128e   :  { %v2562_v60 = vpop.xlane.xlu0 %2561 }
0x128f   :  { %4828 = vrcp.f32 %v2562_v60 }
0x1292   :  { %v4732_v61 = vpop.permute.xlu0 %4731 }
0x1293   :  { %v4734_v62 = vunpack.i.h.bf16 %v4732_v61  ;;  %v4733_v63 = vunpack.i.l.bf16 %v4732_v61 }
0x1295   :  { %v4619_v0 = vpack.c.bf16 %v4734_v62, %v4733_v63 }
0x1296   :  { %v4747_v29 = vpop.permute.xlu0 %4746 }
0x1297   :  { %4620 = vmatpush3.bf16.msra.mxu0 %v4619_v0  ;;  %v4749_v33 = vunpack.i.h.bf16 %v4747_v29  ;;  %v4748_v34 = vunpack.i.l.bf16 %v4747_v29 }
0x1298   :  { %4466 = vmatprep.subr.mxu0 %v2041_v24 }
0x1299   :  { %v4829_v1 = vpop.eup %4828  ;;  %v4629_v12 = vpack.c.bf16 %v4749_v33, %v4748_v34 }
0x129a   :  { %v5342_v2 = vmul.f32 %v4829_v1, %v4825_v58  ;;  %v2565_v3 = vpop.xlane.xlu1 %2564  ;;  %v2973_v41 = vpop.permute.xlu0 %2972 }
0x129b   :  { %4830 = vrcp.f32 %v2565_v3 }
0x129c   :  { %4457 = vmatmul.mubr.msk.f32.vlgmr.msra.gmra.mrb[22].mxu0 %vm2203_vm6, %v5342_v2 }
0x129d   :  { %4467 = vmatpush3.msra.mxu0 %v2041_v24 }
0x129e   :  { %v4737_v4 = vpop.permute.xlu1 %4736  ;;  %4471 = vmatprep.subr.mxu0 %v2040_v25 }
0x129f   :  { %v4739_v6 = vunpack.i.h.bf16 %v4737_v4  ;;  %v4738_v9 = vunpack.i.l.bf16 %v4737_v4 }
0x12a1   :  { %v4622_v10 = vpack.c.bf16 %v4739_v6, %v4738_v9 }
0x12a2   :  { %v4742_v11 = vpop.permute.xlu1 %4741 }
0x12a3   :  { %4623 = vmatpush3.bf16.msra.mxu1 %v4622_v10  ;;  %v4744_v18 = vunpack.i.h.bf16 %v4742_v11  ;;  %v4743_v19 = vunpack.i.l.bf16 %v4742_v11 }
0x12a4   :  { %4624 = vmatprep.subr.bf16.mxu1 %v4969_v16 }
0x12a5   :  { %v4831_v15 = vpop.eup %4830  ;;  %v4625_v20 = vpack.c.bf16 %v4744_v18, %v4743_v19 }
0x12a6   :  { %v5347_v17 = vmul.f32 %v4831_v15, %v4827_v59  ;;  %v2891_v23 = vpop.permute.xlu1 %2890 }
0x12a8   :  { %4464 = vmatmul.mubr.msk.f32.vlgmr.msra.gmra.mrb[32].mxu1 %vm2203_vm6, %v5347_v17 }
0x12a9   :  { %4480 = vmatprep.mubr.msk.f32.mxu1 %vm4958_vm1, %v4957_v8 }
0x12ac   :  { %4627 = vmatpush3.bf16.xpose.msk.msra.mxu1 %vm5246_vm4, %v4625_v20 }
0x12ad   :  { %4632 = vmatprep.subr.bf16.mxu1 %v4969_v16 }
0x12b3   :  { %4481 = vmatmul.mubr.msk.f32.vlgmr.msra.gmra.mrb[34].mxu1 %vm167_vm2, %v2891_v23 }
0x12b4   :  { %4494 = vmatprep.mubr.msk.f32.mxu1 %vm4958_vm1, %v4957_v8 }
0x136f   :  { %v2645_v14 = vpop.f32.mrb[22].mxu0 }
0x1370   :  { %v4458_v27 = vpop.f32.mrb[23].mxu0  ;;  %4468 = vmatprep.mubr.msk.f32.mxu0 %vm167_vm2, %v2645_v14 }
0x137b   :  { %v2724_v28 = vpop.f32.mrb[32].mxu1 }
0x137c   :  { %v4465_v22 = vpop.f32.mrb[33].mxu1  ;;  %4469 = vmatmul.mubr.msk.f32.vlgmr.msra.gmra.mrb[24].mxu0 %vm167_vm2, %v2724_v28 }
0x137d   :  { %4472 = vmatpush3.msra.mxu0 %v2040_v25  ;;  %4473 = vmatprep.mubr.msk.f32.mxu0 %vm167_vm2, %v5320_v36 }
0x137e   :  { %4628 = vmatprep.subr.bf16.mxu0 %v4969_v16 }
0x1384   :  { %4474 = vmatmul.mubr.msk.f32.vlgmr.msra.gmra.mrb[24].mxu0 %vm167_vm2, %v5322_v39 }
0x1385   :  { %4631 = vmatpush3.bf16.xpose.msk.msra.mxu0 %vm5246_vm4, %v4629_v12  ;;  %4487 = vmatprep.mubr.msk.f32.mxu0 %vm4958_vm1, %v4957_v8 }
0x1386   :  { %v2968_v35 = vpop.f32.mrb[34].mxu1 }
0x1387   :  { %v2969_v38 = vadd.f32 %v2968_v35, %v5274_v53  ;;  %v4482_v40 = vpop.f32.mrb[35].mxu1 }
0x1389   :  { %v3054_v36 = vsel %vm2203_vm6, %v2969_v38, -inf }
0x138a   :  { %3055 = vmax.xlane.f32.xlu1 %v3054_v36 }
0x138c   :  { %4488 = vmatmul.mubr.msk.f32.vlgmr.msra.gmra.mrb[26].mxu0 %vm167_vm2, %v2973_v41 }
0x1417   :  { %v3056_v13 = vpop.xlane.xlu1 %3055 }
0x1418   :  { %v3060_v42 = vsub.f32 %v2969_v38, %v3056_v13 }
0x141a   :  { %v3062_v45 = vmul.f32 1.442695, %v3060_v42 }
0x141c   :  { %4832 = vpow2.f32 %v3062_v45 }
0x1426   :  { %v4833_v49 = vpop.eup %4832 }
0x1427   :  { %v3066_v54 = vsel %vm2203_vm6, %v4833_v49, 0.0 }
0x145f   :  { %v3050_v39 = vpop.f32.mrb[26].mxu0 }
0x1460   :  { %v3051_v46 = vadd.f32 %v3050_v39, %v5274_v53  ;;  %v4489_v47 = vpop.f32.mrb[27].mxu0 }
0x1462   :  { %v3057_v48 = vsel %vm2203_vm6, %v3051_v46, -inf }
0x1463   :  { %3058 = vmax.xlane.f32.xlu0 %v3057_v48 }
0x1467   :  { %3067 = vadd.xlane.f32.xlu0 %v3066_v54 }
0x147d   :  { %4751 = vrot.lane.b32.xlu0 %v5253_v43, %s4963_s28 }
0x1481   :  { %4766 = vrot.lane.b32.xlu0 %v5258_v44, %s4967_s5 }
0x1485   :  { %3399 = vrot.lane.b32.xlu0 %v5260_v50, %s4967_s5  ;;  %v2042_v50 = vld [vmem:[#allocation7 + $0x90] sm:$0xff] }
0x1486   :  { %4504 = vmatprep.subr.mxu0 %v2042_v50 }
0x1487   :  { %4505 = vmatpush3.msra.mxu0 %v2042_v50 }
0x1488   :  { %4642 = vmatprep.subr.bf16.mxu0 %v4969_v16 }
0x14f0   :  { %v3059_v52 = vpop.xlane.xlu0 %3058 }
0x14f1   :  { %v3061_v55 = vsub.f32 %v3051_v46, %v3059_v52 }
0x14f3   :  { %v3064_v56 = vmul.f32 1.442695, %v3061_v55 }
0x14f4   :  { %v3068_v57 = vpop.xlane.xlu0 %3067 }
0x14f5   :  { %4834 = vpow2.f32 %v3064_v56 }
0x14f6   :  { %4836 = vrcp.f32 %v3068_v57 }
0x14f8   :  { %v4752_v58 = vpop.permute.xlu0 %4751 }
0x14f9   :  { %v4754_v7 = vunpack.i.h.bf16 %v4752_v58  ;;  %v4753_v5 = vunpack.i.l.bf16 %v4752_v58 }
0x14fb   :  { %v4633_v59 = vpack.c.bf16 %v4754_v7, %v4753_v5 }
0x14fc   :  { %v4767_v23 = vpop.permute.xlu0 %4766 }
0x14fd   :  { %4634 = vmatpush3.bf16.msra.mxu1 %v4633_v59  ;;  %v4769_v24 = vunpack.i.h.bf16 %v4767_v23  ;;  %v4768_v25 = vunpack.i.l.bf16 %v4767_v23  ;;  %v2043_v59 = vld [vmem:[#allocation7 + $0xc8] sm:$0xff] }
0x14fe   :  { %4635 = vmatprep.subr.bf16.mxu1 %v4969_v16 }
0x14ff   :  { %v4835_v21 = vpop.eup %4834  ;;  %v4643_v14 = vpack.c.bf16 %v4769_v24, %v4768_v25 }
0x1500   :  { %v4837_v60 = vpop.eup %4836  ;;  %v3069_v61 = vsel %vm2203_vm6, %v4835_v21, 0.0  ;;  %v3400_v29 = vpop.permute.xlu0 %3399 }
0x1501   :  { %v5384_v62 = vmul.f32 %v4837_v60, %v4833_v49  ;;  %3070 = vadd.xlane.f32.xlu1 %v3069_v61 }
0x1503   :  { %4495 = vmatmul.mubr.msk.f32.vlgmr.msra.gmra.mrb[36].mxu1 %vm2203_vm6, %v5384_v62 }
0x1504   :  { %4501 = vmatprep.mubr.msk.f32.mxu1 %vm4958_vm1, %v4957_v8 }
0x1512   :  { %4756 = vrot.lane.b32.xlu1 %v5258_v44, %s4963_s28 }
0x1516   :  { %4761 = vrot.lane.b32.xlu1 %v5253_v43, %s4967_s5 }
0x151a   :  { %3317 = vrot.lane.b32.xlu1 %v5262_v51, %s4967_s5 }
0x158e   :  { %v3071_v63 = vpop.xlane.xlu1 %3070 }
0x158f   :  { %4838 = vrcp.f32 %v3071_v63 }
0x1592   :  { %v4757_v0 = vpop.permute.xlu1 %4756 }
0x1593   :  { %v4759_v1 = vunpack.i.h.bf16 %v4757_v0  ;;  %v4758_v3 = vunpack.i.l.bf16 %v4757_v0  ;;  %v2044_v0 = vld [vmem:[#allocation7 + $0x1e0] ss:$0 sm:$0xff] }
0x1595   :  { %v4636_v4 = vpack.c.bf16 %v4759_v1, %v4758_v3 }
0x1596   :  { %v4762_v6 = vpop.permute.xlu1 %4761 }
0x1597   :  { %4637 = vmatpush3.bf16.msra.mxu1 %v4636_v4  ;;  %v4764_v11 = vunpack.i.h.bf16 %v4762_v6  ;;  %v4763_v51 = vunpack.i.l.bf16 %v4762_v6 }
0x1598   :  { %4638 = vmatprep.subr.bf16.mxu1 %v4969_v16 }
0x1599   :  { %v4839_v9 = vpop.eup %4838  ;;  %v4639_v15 = vpack.c.bf16 %v4764_v11, %v4763_v51 }
0x159a   :  { %v5398_v10 = vmul.f32 %v4839_v9, %v4835_v21  ;;  %v3318_v18 = vpop.permute.xlu1 %3317 }
0x159c   :  { %4502 = vmatmul.mubr.msk.f32.vlgmr.msra.gmra.mrb[38].mxu1 %vm2203_vm6, %v5398_v10 }
0x159d   :  { %4513 = vmatprep.mubr.msk.f32.mxu1 %vm4958_vm1, %v4957_v8 }
0x15a0   :  { %4641 = vmatpush3.bf16.xpose.msk.msra.mxu1 %vm5246_vm4, %v4639_v15 }
0x15a1   :  { %4646 = vmatprep.subr.bf16.mxu1 %v4969_v16 }
0x15a7   :  { %4514 = vmatmul.mubr.msk.f32.vlgmr.msra.gmra.mrb[40].mxu1 %vm167_vm2, %v3318_v18 }
0x15a8   :  { %4527 = vmatprep.mubr.msk.f32.mxu1 %vm4958_vm1, %v4957_v8 }
0x15d6   :  { %v3151_v19 = vpop.f32.mrb[36].mxu1 }
0x15d7   :  { %v4496_v20 = vpop.f32.mrb[37].mxu1  ;;  %4506 = vmatprep.mubr.msk.f32.mxu0 %vm167_vm2, %v3151_v19 }
0x166f   :  { %v3230_v27 = vpop.f32.mrb[38].mxu1 }
0x1670   :  { %v4503_v28 = vpop.f32.mrb[39].mxu1  ;;  %4507 = vmatmul.mubr.msk.f32.vlgmr.msra.gmra.mrb[24].mxu0 %vm167_vm2, %v3230_v27 }
0x1671   :  { %4645 = vmatpush3.bf16.xpose.msk.msra.mxu0 %vm5246_vm4, %v4643_v14  ;;  %4520 = vmatprep.mubr.msk.f32.mxu0 %vm4958_vm1, %v4957_v8 }
0x1672   :  { %4649 = vmatprep.subr.bf16.mxu0 %v4969_v16 }
0x1678   :  { %4521 = vmatmul.mubr.msk.f32.vlgmr.msra.gmra.mrb[28].mxu0 %vm167_vm2, %v3400_v29  ;;  %v3781_v29 = vld [vmem:[#allocation7 + $0x60] sm:$0xff] }
0x1679   :  { %4534 = vmatprep.mubr.msk.f32.mxu0 %vm4958_vm1, %v4957_v8 }
0x167a   :  { %v3395_v22 = vpop.f32.mrb[40].mxu1 }
0x167b   :  { %v3396_v33 = vadd.f32 %v3395_v22, %v5274_v53  ;;  %v4515_v34 = vpop.f32.mrb[41].mxu1 }
0x167c   :  { %v3783_v34 = vld [vmem:[#allocation7 + $0xd0] sm:$0xff] }
0x167d   :  { %v3481_v12 = vsel %vm2203_vm6, %v3396_v33, -inf }
0x167e   :  { %3482 = vmax.xlane.f32.xlu1 %v3481_v12 }
0x170b   :  { %v3483_v37 = vpop.xlane.xlu1 %3482 }
0x170c   :  { %v3487_v35 = vsub.f32 %v3396_v33, %v3483_v37  ;;  %v3782_v33 = vld [vmem:[#allocation7 + $0x98] sm:$0xff]  ;;  %v3868_v37 = vld [vmem:[#allocation7 + $0x30] sm:$0xff] }
0x170d   :  { %v4656_v12 = vpack.c.bf16 %v3783_v34, %v3782_v33 }
0x170e   :  { %v3489_v38 = vmul.f32 1.442695, %v3487_v35  ;;  %v3869_v35 = vld [vmem:[#allocation7 + $0x68] sm:$0xff] }
0x1710   :  { %4840 = vpow2.f32 %v3489_v38  ;;  %v3870_v38 = vld [vmem:[#allocation7 + $0xa0] sm:$0xff] }
0x171a   :  { %v4841_v13 = vpop.eup %4840 }
0x171b   :  { %v3493_v8 = vsel %vm2203_vm6, %v4841_v13, 0.0 }
0x174b   :  { %v3477_v40 = vpop.f32.mrb[28].mxu0 }
0x174c   :  { %v3478_v16 = vadd.f32 %v3477_v40, %v5274_v53  ;;  %v4522_v36 = vpop.f32.mrb[29].mxu0  ;;  %v4660_v40 = vpack.c.bf16 %v3869_v35, %v3868_v37 }
0x174e   :  { %v3484_v41 = vsel %vm2203_vm6, %v3478_v16, -inf }
0x174f   :  { %3485 = vmax.xlane.f32.xlu0 %v3484_v41  ;;  %v3872_v41 = vld [vmem:[#allocation7 + $0x110] sm:$0xff] }
0x1753   :  { %3494 = vadd.xlane.f32.xlu0 %v3493_v8 }
0x1769   :  { %4771 = vrot.lane.b32.xlu0 %v5253_v43, %s4966_s4 }
0x17dc   :  { %v3486_v42 = vpop.xlane.xlu0 %3485 }
0x17dd   :  { %v3488_v45 = vsub.f32 %v3478_v16, %v3486_v42  ;;  %v3871_v16 = vld [vmem:[#allocation7 + $0xd8] sm:$0xff] }
0x17de   :  { %v4664_v36 = vpack.c.bf16 %v3871_v16, %v3870_v38 }
0x17df   :  { %v3491_v39 = vmul.f32 1.442695, %v3488_v45 }
0x17e0   :  { %v3495_v46 = vpop.xlane.xlu0 %3494 }
0x17e1   :  { %4842 = vpow2.f32 %v3491_v39 }
0x17e2   :  { %4844 = vrcp.f32 %v3495_v46 }
0x17e4   :  { %v4772_v47 = vpop.permute.xlu0 %4771 }
0x17e5   :  { %v4774_v48 = vunpack.i.h.bf16 %v4772_v47  ;;  %v4773_v53 = vunpack.i.l.bf16 %v4772_v47 }
0x17e7   :  { %v4647_v49 = vpack.c.bf16 %v4774_v48, %v4773_v53 }
0x17e9   :  { %4648 = vmatpush3.bf16.msra.mxu1 %v4647_v49  ;;  %v3748_v49 = vld [vmem:[#allocation7 + $0x208] ss:$0 sm:$0xff] }
0x17eb   :  { %v4843_v54 = vpop.eup %4842 }
0x17ec   :  { %v4845_v52 = vpop.eup %4844  ;;  %v3496_v55 = vsel %vm2203_vm6, %v4843_v54, 0.0 }
0x17ed   :  { %v5428_v56 = vmul.f32 %v4845_v52, %v4841_v13  ;;  %3497 = vadd.xlane.f32.xlu1 %v3496_v55  ;;  %v3873_v13 = vld [vmem:[#allocation7 + $0x148] sm:$0xff] }
0x17ee   :  { %v4668_v8 = vpack.c.bf16 %v3873_v13, %v3872_v41  ;;  %v3962_v41 = vld [vmem:[#allocation7 + $0x220] ss:$0 sm:$0xff] }
0x17ef   :  { %4528 = vmatmul.mubr.msk.f32.vlgmr.msra.gmra.mrb[42].mxu1 %vm2203_vm6, %v5428_v56 }
0x17fe   :  { %4776 = vrot.lane.b32.xlu1 %v5258_v44, %s4966_s4 }
0x187a   :  { %v3498_v43 = vpop.xlane.xlu1 %3497 }
0x187b   :  { %4846 = vrcp.f32 %v3498_v43  ;;  %v3749_v43 = vld [vmem:[#allocation7 + $0x210] ss:$0 sm:$0xff] }
0x187e   :  { %v4777_v57 = vpop.permute.xlu1 %4776 }
0x187f   :  { %v4779_v58 = vunpack.i.h.bf16 %v4777_v57  ;;  %v4778_v7 = vunpack.i.l.bf16 %v4777_v57 }
0x1881   :  { %v4650_v5 = vpack.c.bf16 %v4779_v58, %v4778_v7 }
0x1883   :  { %4651 = vmatpush3.bf16.msra.mxu0 %v4650_v5 }
0x1884   :  { %4537 = vmatprep.subr.mxu0 %v2043_v59 }
0x1885   :  { %v4847_v21 = vpop.eup %4846 }
0x1886   :  { %v5434_v60 = vmul.f32 %v4847_v21, %v4843_v54  ;;  %v3875_v21 = vld [vmem:[#allocation7 + $0x1b8] sm:$0xff] }
0x1888   :  { %4535 = vmatmul.mubr.msk.f32.vlgmr.msra.gmra.mrb[30].mxu0 %vm2203_vm6, %v5434_v60 }
0x1889   :  { %4538 = vmatpush3.msra.mxu0 %v2043_v59  ;;  %v3874_v59 = vld [vmem:[#allocation7 + $0x180] sm:$0xff] }
0x188a   :  { %4661 = vmatprep.subr.bf16.mxu0 %v4660_v40 }
0x18c2   :  { %v3578_v61 = vpop.f32.mrb[42].mxu1 }
0x18c3   :  { %v4529_v50 = vpop.f32.mrb[43].mxu1  ;;  %4539 = vmatprep.mubr.msk.f32.mxu0 %vm167_vm2, %v3578_v61  ;;  %v4672_v61 = vpack.c.bf16 %v3875_v21, %v3874_v59 }
0x18c4   :  { %v3784_v50 = vld [vmem:[#allocation7 + $0x1e8] ss:$0 sm:$0xff] }
0x195b   :  { %v3657_v44 = vpop.f32.mrb[30].mxu0 }
0x195c   :  { %v4536_v63 = vpop.f32.mrb[31].mxu0  ;;  %4540 = vmatmul.mubr.msk.f32.vlgmr.msra.gmra.mrb[24].mxu0 %vm167_vm2, %v3657_v44 }
0x195d   :  { %4663 = vmatpush3.bf16.msra.mxu0 %v4660_v40 }
0x195e   :  { %4665 = vmatprep.subr.bf16.mxu0 %v4664_v36 }
0x1961   :  { %4667 = vmatpush3.bf16.msra.mxu0 %v4664_v36 }
0x1962   :  { %4669 = vmatprep.subr.bf16.mxu0 %v4668_v8 }
0x1965   :  { %4671 = vmatpush3.bf16.msra.mxu0 %v4668_v8 }
0x1966   :  { %4673 = vmatprep.subr.bf16.mxu0 %v4672_v61 }
0x1969   :  { %4675 = vmatpush3.bf16.msra.mxu0 %v4672_v61 }
0x1a2f   :  { %v4541_v1 = vpop.f32.mrb[24].mxu0 }
0x1a30   :  { %v3745_v3 = vadd.f32 %v4541_v1, %v2044_v0  ;;  %v3733_v4 = vpop.f32.mrb[25].mxu0 }
0x1a31   :  { %v3744_v6 = vadd.f32 %v3733_v4, %v2044_v0 }
0x1a32   :  { %v3747_v9 = vadd.f32 %v3745_v3, %v5236_v32 }
0x1a33   :  { %v3746_v11 = vadd.f32 %v3744_v6, %v5234_v31  ;;  %v3780_v31 = vld [vmem:[#allocation7 + $0x28] sm:$0xff]  ;;  %v3876_v6 = vld [vmem:[#allocation7 + $0x1f0] ss:$0 sm:$0xff] }
0x1a34   :  { %v3753_v51 = vsel %vm75_vm0, %v3747_v9, 0.0  ;;  %v4652_v22 = vpack.c.bf16 %v3781_v29, %v3780_v31 }
0x1a35   :  { %3754 = vadd.xlane.f32.xlu0 %v3753_v51  ;;  %v3750_v15 = vsel %vm75_vm0, %v3746_v11, 0.0 }
0x1a36   :  { %3751 = vadd.xlane.f32.xlu1 %v3750_v15  ;;  %4653 = vmatprep.subr.bf16.mxu1 %v4652_v22 }
0x1a37   :  { %4655 = vmatpush3.bf16.msra.mxu1 %v4652_v22 }
0x1a38   :  { %4657 = vmatprep.subr.bf16.mxu1 %v4656_v12 }
0x1a3b   :  { %4659 = vmatpush3.bf16.msra.mxu1 %v4656_v12 }
0x1ac2   :  { %v3755_v18 = vpop.xlane.xlu0 %3754 }
0x1ac3   :  { %v3757_v19 = vmul.f32 0.03125, %v3755_v18  ;;  %v3752_v20 = vpop.xlane.xlu1 %3751 }
0x1ac4   :  { %v3756_v23 = vmul.f32 0.03125, %v3752_v20 }
0x1ac5   :  { %v3759_v24 = vsub.f32 %v3747_v9, %v3757_v19 }
0x1ac6   :  { %v3758_v25 = vsub.f32 %v3746_v11, %v3756_v23 }
0x1ac7   :  { %v3761_v14 = vmul.f32 %v3759_v24, %v3759_v24 }
0x1ac8   :  { %v3760_v27 = vmul.f32 %v3758_v25, %v3758_v25 }
0x1ac9   :  { %v3765_v28 = vsel %vm75_vm0, %v3761_v14, 0.0 }
0x1aca   :  { %3766 = vadd.xlane.f32.xlu1 %v3765_v28  ;;  %v3762_v32 = vsel %vm75_vm0, %v3760_v27, 0.0 }
0x1acb   :  { %3763 = vadd.xlane.f32.xlu0 %v3762_v32 }
0x1b57   :  { %v3767_v42 = vpop.xlane.xlu1 %3766 }
0x1b58   :  { %v3769_v45 = vmul.f32 0.03125, %v3767_v42  ;;  %v3764_v39 = vpop.xlane.xlu0 %3763 }
0x1b59   :  { %v3768_v46 = vmul.f32 0.03125, %v3764_v39 }
0x1b5a   :  { %v3771_v47 = vadd.f32 1e-05, %v3769_v45 }
0x1b5b   :  { %v3770_v48 = vadd.f32 1e-05, %v3768_v46 }
0x1b5c   :  { %4848 = vrsqrt.f32 %v3771_v47 }
0x1b5d   :  { %4850 = vrsqrt.f32 %v3770_v48 }
0x1b66   :  { %v4849_v53 = vpop.eup %4848 }
0x1b67   :  { %v4851_v54 = vpop.eup %4850  ;;  %v3775_v52 = vmul.f32 %v4849_v53, %v3759_v24 }
0x1b68   :  { %v3774_v55 = vmul.f32 %v4851_v54, %v3758_v25 }
0x1b69   :  { %v3777_v57 = vmul.f32 %v3775_v52, %v3748_v49 }
0x1b6a   :  { %v3776_v58 = vmul.f32 %v3774_v55, %v3748_v49 }
0x1b6b   :  { %v3779_v5 = vadd.f32 %v3777_v57, %v3749_v43 }
0x1b6c   :  { %v3778_v7 = vadd.f32 %v3776_v58, %v3749_v43 }
0x1b6e   :  { %4550 = vmatprep.mubr.msk.f32.mxu1 %vm75_vm0, %v3778_v7 }
0x1b6f   :  { %4551 = vmatmul.mubr.msk.f32.vlgmr.msra.gmra.mrb[44].mxu1 %vm75_vm0, %v3779_v5 }
0x1c42   :  { %v4552_v44 = vpop.f32.mrb[44].mxu1 }
0x1c43   :  { %v3863_v63 = vadd.f32 %v4552_v44, %v3784_v50  ;;  %v3857_v0 = vpop.f32.mrb[45].mxu1 }
0x1c44   :  { %v3858_v1 = vadd.f32 %v3857_v0, %v3784_v50 }
0x1c45   :  { %v3867_v4 = vmax.f32 %v3863_v63, 0.0 }
0x1c46   :  { %v3866_v3 = vmax.f32 %v3858_v1, 0.0 }
0x1c48   :  { %4569 = vmatprep.mubr.msk.f32.mxu0 %vm3877_vm7, %v3866_v3 }
0x1c49   :  { %4570 = vmatmul.mubr.msk.f32.vlgmr.msra.gmra.mrb[32].mxu0 %vm3877_vm7, %v3867_v4 }
0x1d1c   :  { %v4571_v9 = vpop.f32.mrb[32].mxu0 }
0x1d1d   :  { %v3956_v11 = vadd.f32 %v4571_v9, %v3876_v6  ;;  %v3950_v51 = vpop.f32.mrb[33].mxu0 }
0x1d1e   :  { %v3951_v15 = vadd.f32 %v3950_v51, %v3876_v6 }
0x1d1f   :  { %v3960_v18 = vadd.f32 %v3956_v11, %v3779_v5 }
0x1d20   :  { %v3959_v19 = vadd.f32 %v3951_v15, %v3778_v7 }
0x1d21   :  { %v3966_v20 = vsel %vm75_vm0, %v3960_v18, 0.0 }
0x1d22   :  { %3967 = vadd.xlane.f32.xlu1 %v3966_v20  ;;  %v3963_v23 = vsel %vm75_vm0, %v3959_v19, 0.0 }
0x1d23   :  { %3964 = vadd.xlane.f32.xlu0 %v3963_v23 }
0x1d33   :  { %3995 = vrot.lane.b32.xlu1 %v5304_v30, %s4970_s7 }
0x1d37   :  { %3999 = vrot.lane.b32.xlu1 %v5342_v2, %s4965_s30 }
0x1d39   :  { %3993 = vrot.lane.b32.xlu0 %v5295_v26, %s4970_s7 }
0x1daf   :  { %v3968_v24 = vpop.xlane.xlu1 %3967 }
0x1db0   :  { %v3970_v25 = vmul.f32 0.03125, %v3968_v24  ;;  %v3965_v14 = vpop.xlane.xlu0 %3964 }
0x1db1   :  { %v3969_v27 = vmul.f32 0.03125, %v3965_v14 }
0x1db2   :  { %v3972_v28 = vsub.f32 %v3960_v18, %v3970_v25 }
0x1db3   :  { %v3971_v32 = vsub.f32 %v3959_v19, %v3969_v27  ;;  %v3996_v26 = vpop.permute.xlu1 %3995 }
0x1db4   :  { %v3974_v31 = vmul.f32 %v3972_v28, %v3972_v28  ;;  %v3994_v2 = vpop.permute.xlu0 %3993 }
0x1db5   :  { %v3973_v29 = vmul.f32 %v3971_v32, %v3971_v32 }
0x1db6   :  { %v3978_v22 = vsel %vm75_vm0, %v3974_v31, 0.0 }
0x1db7   :  { %3979 = vadd.xlane.f32.xlu1 %v3978_v22  ;;  %v3975_v33 = vsel %vm75_vm0, %v3973_v29, 0.0  ;;  %v4000_v30 = vpop.permute.xlu1 %3999 }
0x1db8   :  { %3976 = vadd.xlane.f32.xlu0 %v3975_v33 }
0x1dc8   :  { %4005 = vrot.lane.b32.xlu1 %v5384_v62, %s4960_s23 }
0x1dcc   :  { %4011 = vrot.lane.b32.xlu1 %v5428_v56, %s4963_s28 }
0x1dce   :  { %4001 = vrot.lane.b32.xlu0 %v5347_v17, %s4965_s30  ;;  %v3961_v17 = vld [vmem:[#allocation7 + $0x218] ss:$0 sm:$0xff] }
0x1dd2   :  { %4007 = vrot.lane.b32.xlu0 %v5398_v10, %s4960_s23 }
0x1dd6   :  { %4013 = vrot.lane.b32.xlu0 %v5434_v60, %s4963_s28 }
0x1e44   :  { %v3980_v34 = vpop.xlane.xlu1 %3979 }
0x1e45   :  { %v3982_v12 = vmul.f32 0.03125, %v3980_v34  ;;  %v3977_v37 = vpop.xlane.xlu0 %3976 }
0x1e46   :  { %v3981_v35 = vmul.f32 0.03125, %v3977_v37 }
0x1e47   :  { %v3984_v62 = vadd.f32 1e-05, %v3982_v12 }
0x1e48   :  { %v3983_v38 = vadd.f32 1e-05, %v3981_v35  ;;  %v4006_v8 = vpop.permute.xlu1 %4005 }
0x1e49   :  { %4852 = vrsqrt.f32 %v3984_v62  ;;  %v4002_v56 = vpop.permute.xlu0 %4001 }
0x1e4a   :  { %4854 = vrsqrt.f32 %v3983_v38 }
0x1e4c   :  { %v4012_v55 = vpop.permute.xlu1 %4011 }
0x1e4d   :  { %v4008_v60 = vpop.permute.xlu0 %4007 }
0x1e51   :  { %v4014_v54 = vpop.permute.xlu0 %4013 }
0x1e53   :  { %v4853_v40 = vpop.eup %4852 }
0x1e54   :  { %v4855_v16 = vpop.eup %4854  ;;  %v3988_v36 = vmul.f32 %v4853_v40, %v3972_v28 }
0x1e55   :  { %v3987_v10 = vmul.f32 %v4855_v16, %v3971_v32 }
0x1e56   :  { %v3990_v13 = vmul.f32 %v3988_v36, %v3961_v17 }
0x1e57   :  { %v3989_v42 = vmul.f32 %v3987_v10, %v3961_v17 }
0x1e58   :  { %v3992_v45 = vadd.f32 %v3990_v13, %v3962_v41 }
0x1e59   :  { %v3991_v39 = vadd.f32 %v3989_v42, %v3962_v41 }
0x1e5a   :  { %v4018_v46 = vsel %vm75_vm0, %v3992_v45, %v3996_v26 }
0x1e5b   :  { %v4017_v47 = vsel %vm75_vm0, %v3991_v39, %v3994_v2  ;;  %v4021_v48 = vsel %vm4019_vm8, %v4018_v46, %v4002_v56 }
0x1e5c   :  { %v4020_v53 = vsel %vm4019_vm8, %v4017_v47, %v4000_v30  ;;  %v4023_v49 = vsel %vm3877_vm7, %v4021_v48, %v4008_v60 }
0x1e5d   :  { %v4022_v52 = vsel %vm3877_vm7, %v4020_v53, %v4006_v8  ;;  %v4026_v43 = vsel %vm4024_vm9, %v4023_v49, %v4014_v54 }
0x1e5e   :  { %v4025_v57 = vsel %vm4024_vm9, %v4022_v52, %v4012_v55  ;;  %v4029_v58 = vsel %vm4027_vm10, %v4026_v43, 0.0 }
0x1e5f   :  { %v4028_v7 = vsel %vm4027_vm10, %v4025_v57, 0.0  ;;  %4031 = vst [vmem:[#allocation8 + $0x8] sm:$0xff] %v4029_v58 }
0x1e60   :  { %4030 = vst [vmem:[#allocation8] sm:$0xff] %v4028_v7 }
0x1e61   :  { %4933 = shalt.err (!%p4930_p0)
}
0x1e62   :  { %s4934_s12 = scalar_lea.hbm %s5490_s3, 256 }
0x1e63   :  { %p4935_p1 = scmp.ne.s32.totalorder %s5490_s3, %s4934_s12  ;;  %p4938_p2 = scmp.lt.u32.totalorder %s4934_s12, %s5490_s3 }
0x1e65   :  { %p4940_p3 = pnand %p4938_p2, %p4935_p1 }
0x1e67   :  { %4943 = shalt.err (!%p4940_p3)
}
0x1e68   :  { %4043 = dma.vmem_to_hbm [thread:$0]  %s4038_s1, 256, %s5490_s3, [#allocation4], %s4952_s24, %s4952_s24, %s4953_s25  }
0x1e69   :  { %4948 = dma.done.wait [#allocation4], 256  }
0x1e6a   :  { %4949 = vsyncadd [#allocation4], 4294967040 }
0x1e6b   :  { %4047 = vsyncpa [#allocation3], 1 }
0x1e6c   :  { %4048 = vsyncpa [#allocation6], 1 }
0x1e6d   :  { %4049 = vsyncpa [#allocation4], 1 }

</bundles_post_ra>
